<compile_context>
chip_gen: v6e
topology: v6e:2x2x1
jax: 0.10.0
libtpu: 0.0.40
codegen_flags: <defaults>
</compile_context>

<pallas_src>
import functools

import jax
import jax.numpy as jnp
from jax.experimental import pallas as pl
from jax.experimental.pallas import tpu as pltpu

N_BRANCH = 4          # rbr_dense, rbr_dense_2, rbr_dense_3, rbr_dense_4
BN_EPS = 1e-5         # nn.BatchNorm2d default eps
LANE = 128
SUBLANE = 8


def _round_up(x, m):
    return (x + m - 1) // m * m


def _cdiv(a, b):
    return -(-a // b)


# ---------------------------------------------------------------------------
# Kernels
# ---------------------------------------------------------------------------

def repvgg_kernel_fused(x_ref, w_ref, b_ref, o_ref, col_ref, *,
                        tile_m, wp, ksize_h, ksize_w, cin):
    """Small-Cin path: im2col-in-VMEM + one matmul with K = KH*KW*Cin.

    x_ref:   (Lin, Cin)          flattened zero-padded NHWC image (whole image, reused)
    w_ref:   (KH*KW*Cin, Cpad)   BN-folded, branch-fused conv weight, taps folded into K
    b_ref:   (1, Cpad) f32       fused bias
    o_ref:   (tile_m, Cpad)      output rows (lane-dense channels)
    col_ref: (tile_m, KH*KW*Cin) VMEM im2col staging scratch
    """
    i = pl.program_id(1)
    base = pl.multiple_of(i * tile_m, SUBLANE)
    # Each conv tap (kh, kw) is a constant row offset kh*wp + kw into the flattened padded
    # image; stage the KH*KW shifted slices into the col scratch (never materialized in HBM).
    for t in range(ksize_h * ksize_w):
        kh, kw = t // ksize_w, t % ksize_w
        start = pl.multiple_of(base + kh * wp, SUBLANE) + kw      # wp is a multiple of 8
        col_ref[:, t * cin:(t + 1) * cin] = x_ref[pl.ds(start, tile_m), :]
    y = jnp.dot(col_ref[...], w_ref[...], preferred_element_type=jnp.float32)
    o_ref[...] = jnp.maximum(y + b_ref[...], 0.0).astype(o_ref.dtype)   # ReLU


def repvgg_kernel_taps(x_ref, w_ref, b_ref, o_ref, acc_ref, *,
                       tile_m, wp, ksize_h, ksize_w):
    """Large-Cin path: per-tap dots; the first tap initializes the accumulator with the bias
    folded in (no zero-fill store, no epilogue bias add).

    x_ref:   (Lin, Cin)            flattened zero-padded NHWC image
    w_ref:   (KH*KW, Cin, Cpad)    BN-folded, branch-fused conv weight per tap
    b_ref:   (1, Cpad) f32         fused bias
    o_ref:   (tile_m, Cpad)        output rows
    acc_ref: (tile_m, Cpad) f32    VMEM accumulator scratch
    """
    i = pl.program_id(1)
    base = pl.multiple_of(i * tile_m, SUBLANE)
    for t in range(ksize_h * ksize_w):
        kh, kw = t // ksize_w, t % ksize_w
        start = pl.multiple_of(base + kh * wp, SUBLANE) + kw
        xs = x_ref[pl.ds(start, tile_m), :]
        d = jnp.dot(xs, w_ref[t], preferred_element_type=jnp.float32)
        if t == 0:
            acc_ref[...] = d + b_ref[...]
        else:
            acc_ref[...] += d
    o_ref[...] = jnp.maximum(acc_ref[...], 0.0).astype(o_ref.dtype)     # ReLU


# ---------------------------------------------------------------------------
# Wrapper
# ---------------------------------------------------------------------------

def _vmem_budget_bytes():
    """Generation-aware scoped-VMEM budget. Conservative default fits every chip (v7x: 64 MiB
    physical per TC); bump when the device clearly reports a 128 MiB generation."""
    try:
        kind = jax.devices()[0].device_kind.lower()
    except Exception:
        kind = ""
    if any(tag in kind for tag in ("v4", "v5", "v6")):
        return 100 * 1024 * 1024
    return 48 * 1024 * 1024


def repvgg_block(x_nchw, weights, gammas, betas, means, variances, *,
                 tile_m=512, compute_dtype=None):
    """x_nchw: (N, Cin, H, W), weights: (4, Cout, Cin, KH, KW). Returns (N, Cout, H, W)."""
    N, Cin, H, W = x_nchw.shape
    _, Cout, _, KH, KW = weights.shape
    ph, pw = KH // 2, KW // 2
    Hp = H + 2 * ph
    # Pad the flattened row stride to a sublane multiple so kh*Wp tap offsets stay aligned
    # (only the kw=1..KW-1 offsets remain misaligned); extra columns are throwaway.
    Wp = _round_up(W + 2 * pw, SUBLANE)

    if compute_dtype is None:
        compute_dtype = x_nchw.dtype   # use jnp.bfloat16 at production shapes (see TODO above)

    # ---- host: fold inference BN into each branch's conv and fuse all 4 branches (exact) ----
    scale = gammas * jax.lax.rsqrt(variances + BN_EPS)                  # (4, Cout)
    w_fused = jnp.einsum('boikl,bo->oikl', weights, scale)              # (Cout, Cin, KH, KW)
    b_fused = jnp.sum(betas - means * scale, axis=0)                    # (Cout,)

    Cpad = _round_up(Cout, LANE)       # lane-dense output channels (128; use 256 only if Cout allows)
    Kf = KH * KW * Cin
    fuse_taps = Cin < LANE             # small Cin -> fold all taps into the contraction dim

    if fuse_taps:
        # (KH*KW*Cin, Cpad): col[:, t*Cin + c] pairs with w[(kh,kw,c), o]
        w_mat = jnp.transpose(w_fused, (2, 3, 1, 0)).reshape(Kf, Cout)
        w_mat = jnp.pad(w_mat, ((0, 0), (0, Cpad - Cout))).astype(compute_dtype)
    else:
        # (KH*KW, Cin, Cpad): one dot per tap
        w_mat = jnp.transpose(w_fused, (2, 3, 1, 0)).reshape(KH * KW, Cin, Cout)
        w_mat = jnp.pad(w_mat, ((0, 0), (0, 0), (0, Cpad - Cout))).astype(compute_dtype)
    bias = jnp.pad(b_fused, (0, Cpad - Cout)).reshape(1, Cpad).astype(jnp.float32)

    # ---- host: NCHW -> zero-padded NHWC -> flattened rows (NO KH*KW im2col in HBM) ----
    # TODO(synk): accepting/producing NHWC directly would drop two activation-sized HBM passes.
    x = jnp.transpose(x_nchw, (0, 2, 3, 1))                             # (N, H, W, Cin)
    x_pad = jnp.pad(x, ((0, 0), (ph, ph), (pw, Wp - W - pw), (0, 0)))   # (N, Hp, Wp, Cin)
    x_flat = x_pad.reshape(N, Hp * Wp, Cin).astype(compute_dtype)

    # Output is computed width-padded: M_out = H*Wp rows; the Wp-W extra columns per row are
    # throwaway (dropped below) so every tap access stays a contiguous shifted slice.
    M_out = H * Wp
    in_isz = jnp.dtype(compute_dtype).itemsize
    out_isz = jnp.dtype(x_nchw.dtype).itemsize
    budget = _vmem_budget_bytes()

    tm = min(_round_up(tile_m, SUBLANE), _round_up(M_out, SUBLANE))
    if M_out >= 2 * SUBLANE:
        # guarantee >= 2 row tiles so both v7x TensorCores have parallel work even at N=1
        tm = min(tm, _round_up(_cdiv(M_out, 2), SUBLANE))

    def vmem_estimate(tm_):
        m_tiles_ = _cdiv(M_out, tm_)
        lin_ = m_tiles_ * tm_ + (KH - 1) * Wp + (KW - 1)
        x_b = lin_ * _round_up(Cin, LANE) * in_isz * 2                  # image block, double-buffered
        w_b = (Kf if fuse_taps else KH * KW * Cin) * Cpad * in_isz      # Buffered(1)
        o_b = tm_ * Cpad * out_isz * 2                                  # output tile, double-buffered
        s_b = tm_ * _round_up(Kf, LANE) * in_isz if fuse_taps else tm_ * Cpad * 4
        return x_b + w_b + Cpad * 4 + o_b + s_b

    while vmem_estimate(tm) > budget - (8 << 20) and tm > SUBLANE:
        tm = max(_round_up(_cdiv(tm, 2), SUBLANE), SUBLANE)

    M_tiles = _cdiv(M_out, tm)
    M_pad = M_tiles * tm
    Lin = M_pad + (KH - 1) * Wp + (KW - 1)          # rows the kernel may touch (>= Hp*Wp)
    x_flat = jnp.pad(x_flat, ((0, 0), (0, Lin - Hp * Wp), (0, 0)))      # (N, Lin, Cin)

    if fuse_taps:
        kernel = functools.partial(repvgg_kernel_fused, tile_m=tm, wp=Wp,
                                   ksize_h=KH, ksize_w=KW, cin=Cin)
        w_spec = pl.BlockSpec((Kf, Cpad), lambda n, i: (0, 0),
                              pipeline_mode=pl.Buffered(1))
        scratch = [pltpu.VMEM((tm, Kf), compute_dtype)]
    else:
        kernel = functools.partial(repvgg_kernel_taps, tile_m=tm, wp=Wp,
                                   ksize_h=KH, ksize_w=KW)
        w_spec = pl.BlockSpec((KH * KW, Cin, Cpad), lambda n, i: (0, 0, 0),
                              pipeline_mode=pl.Buffered(1))
        scratch = [pltpu.VMEM((tm, Cpad), jnp.float32)]

    out = pl.pallas_call(
        kernel,
        out_shape=jax.ShapeDtypeStruct((N, M_pad, Cpad), x_nchw.dtype),
        grid_spec=pltpu.PrefetchScalarGridSpec(
            num_scalar_prefetch=0,
            grid=(N, M_tiles),
            in_specs=[
                # whole flattened image per n; constant over the row-tile axis -> fetched once per n
                pl.BlockSpec((None, Lin, Cin), lambda n, i: (n, 0, 0)),
                w_spec,                                                   # grid-invariant weight
                pl.BlockSpec((1, Cpad), lambda n, i: (0, 0),
                             pipeline_mode=pl.Buffered(1)),               # grid-invariant bias
            ],
            out_specs=pl.BlockSpec((None, tm, Cpad), lambda n, i: (n, i, 0)),
            scratch_shapes=scratch,
        ),
        compiler_params=pltpu.CompilerParams(
            dimension_semantics=("parallel", "parallel"),
            vmem_limit_bytes=budget,
        ),
    )(x_flat, w_mat, bias)

    # strip row padding, throwaway width columns and channel padding; back to NCHW
    y = out[:, :M_out, :Cout].reshape(N, H, Wp, Cout)[:, :, :W, :]
    return jnp.transpose(y, (0, 3, 1, 2))


# ---------------------------------------------------------------------------
# Pure-JAX reference (per-branch conv + inference BN, sum, ReLU; NCHW)
# ---------------------------------------------------------------------------

def reference(x_nchw, weights, gammas, betas, means, variances):
    acc = jnp.zeros((x_nchw.shape[0], weights.shape[1],
                     x_nchw.shape[2], x_nchw.shape[3]), jnp.float32)
    for b in range(N_BRANCH):
        conv = jax.lax.conv_general_dilated(
            x_nchw, weights[b], window_strides=(1, 1), padding="SAME",
            dimension_numbers=("NCHW", "OIHW", "NCHW"))
        scale = (gammas[b] * jax.lax.rsqrt(variances[b] + BN_EPS))[None, :, None, None]
        acc = acc + (conv - means[b][None, :, None, None]) * scale + betas[b][None, :, None, None]
    return jnp.maximum(acc, 0.0)


if __name__ == "__main__":
    # RepVGGBlock(in_channels=4, out_channels=8, kernel_size=3, stride=1): input (2, 4, 16, 16).
    N, Cin, Cout, H, W, KS = 2, 4, 8, 16, 16, 3

    key = jax.random.PRNGKey(0)
    k_x, k_w, k_g, k_b, k_m, k_v = jax.random.split(key, 6)

    x = jax.random.normal(k_x, (N, Cin, H, W), dtype=jnp.float32)

    # 4 conv branches (Conv2d(Cin, Cout, 3, 1, 1, bias=False)) + 4 BatchNorm2d(Cout)
    weights = jax.random.normal(k_w, (N_BRANCH, Cout, Cin, KS, KS), dtype=jnp.float32) * 0.1
    gammas = 1.0 + 0.1 * jax.random.normal(k_g, (N_BRANCH, Cout), dtype=jnp.float32)
    betas = 0.1 * jax.random.normal(k_b, (N_BRANCH, Cout), dtype=jnp.float32)
    means = 0.1 * jax.random.normal(k_m, (N_BRANCH, Cout), dtype=jnp.float32)
    variances = 0.5 + jax.random.uniform(k_v, (N_BRANCH, Cout), dtype=jnp.float32)

    y = repvgg_block(x, weights, gammas, betas, means, variances)
    y = jax.block_until_ready(y)

    y_ref = jax.block_until_ready(reference(x, weights, gammas, betas, means, variances))
    assert y.shape == (N, Cout, H, W)
    assert jnp.allclose(y, y_ref, rtol=1e-4, atol=1e-4), "Pallas output mismatch vs reference"

    print("KERNEL_OK")
</pallas_src>

<mosaic_0001>
module attributes {stable_mosaic.version = 11 : i64} {
  func.func @repvgg_kernel_fused(%arg0: i32, %arg1: i32, %arg2: memref<1x434x4xf32, #tpu.memory_space<vmem>>, %arg3: memref<36x128xf32, #tpu.memory_space<vmem>>, %arg4: memref<1x128xf32, #tpu.memory_space<vmem>>, %arg5: memref<1x192x128xf32, #tpu.memory_space<vmem>>, %arg6: memref<192x36xf32, #tpu.memory_space<vmem>>) attributes {dimension_semantics = [#tpu.dimension_semantics<parallel>, #tpu.dimension_semantics<parallel>], iteration_bounds = array<i64: 2, 2>, scalar_prefetch = 0 : i64, scratch_operands = 1 : i64, tpu.core_type = #tpu.core_type<tc>, window_params = [{transform_indices = @transform_0, window_bounds = array<i64: 1, 434, 4>}, {pipeline_mode = #tpu.pipeline_mode<synchronous>, transform_indices = @transform_1, window_bounds = array<i64: 36, 128>}, {pipeline_mode = #tpu.pipeline_mode<synchronous>, transform_indices = @transform_2, window_bounds = array<i64: 1, 128>}, {transform_indices = @transform_3, window_bounds = array<i64: 1, 192, 128>}]} {
    %c192_i32 = arith.constant 192 : i32
    %0 = arith.muli %arg1, %c192_i32 : i32
    %1 = tpu.assume_multiple %0, 8 : i32
    %c0_i32 = arith.constant 0 : i32
    %2 = arith.addi %1, %c0_i32 : i32
    %3 = tpu.assume_multiple %2, 8 : i32
    %c0_i32_0 = arith.constant 0 : i32
    %4 = arith.addi %3, %c0_i32_0 : i32
    %c0 = arith.constant 0 : index
    %5 = arith.index_cast %4 : i32 to index
    %c0_1 = arith.constant 0 : index
    %6 = vector.load %arg2[%c0, %5, %c0_1] : memref<1x434x4xf32, #tpu.memory_space<vmem>>, vector<1x192x4xf32>
    %7 = vector.shape_cast %6 : vector<1x192x4xf32> to vector<192x4xf32>
    %c0_2 = arith.constant 0 : index
    %c0_3 = arith.constant 0 : index
    %8 = vector.load %arg6[%c0_2, %c0_3] : memref<192x36xf32, #tpu.memory_space<vmem>>, vector<192x4xf32>
    tpu.vector_store %arg6[%c0_2, %c0_3], %7 {strides = array<i32>} : memref<192x36xf32, #tpu.memory_space<vmem>>, vector<192x4xf32>,
    %c0_i32_4 = arith.constant 0 : i32
    %9 = arith.addi %1, %c0_i32_4 : i32
    %10 = tpu.assume_multiple %9, 8 : i32
    %c1_i32 = arith.constant 1 : i32
    %11 = arith.addi %10, %c1_i32 : i32
    %c0_5 = arith.constant 0 : index
    %12 = arith.index_cast %11 : i32 to index
    %c0_6 = arith.constant 0 : index
    %13 = vector.load %arg2[%c0_5, %12, %c0_6] : memref<1x434x4xf32, #tpu.memory_space<vmem>>, vector<1x192x4xf32>
    %14 = vector.shape_cast %13 : vector<1x192x4xf32> to vector<192x4xf32>
    %c0_7 = arith.constant 0 : index
    %c4 = arith.constant 4 : index
    %15 = vector.load %arg6[%c0_7, %c4] : memref<192x36xf32, #tpu.memory_space<vmem>>, vector<192x4xf32>
    tpu.vector_store %arg6[%c0_7, %c4], %14 {strides = array<i32>} : memref<192x36xf32, #tpu.memory_space<vmem>>, vector<192x4xf32>,
    %c0_i32_8 = arith.constant 0 : i32
    %16 = arith.addi %1, %c0_i32_8 : i32
    %17 = tpu.assume_multiple %16, 8 : i32
    %c2_i32 = arith.constant 2 : i32
    %18 = arith.addi %17, %c2_i32 : i32
    %c0_9 = arith.constant 0 : index
    %19 = arith.index_cast %18 : i32 to index
    %c0_10 = arith.constant 0 : index
    %20 = vector.load %arg2[%c0_9, %19, %c0_10] : memref<1x434x4xf32, #tpu.memory_space<vmem>>, vector<1x192x4xf32>
    %21 = vector.shape_cast %20 : vector<1x192x4xf32> to vector<192x4xf32>
    %c0_11 = arith.constant 0 : index
    %c8 = arith.constant 8 : index
    %22 = vector.load %arg6[%c0_11, %c8] : memref<192x36xf32, #tpu.memory_space<vmem>>, vector<192x4xf32>
    tpu.vector_store %arg6[%c0_11, %c8], %21 {strides = array<i32>} : memref<192x36xf32, #tpu.memory_space<vmem>>, vector<192x4xf32>,
    %c24_i32 = arith.constant 24 : i32
    %23 = arith.addi %1, %c24_i32 : i32
    %24 = tpu.assume_multiple %23, 8 : i32
    %c0_i32_12 = arith.constant 0 : i32
    %25 = arith.addi %24, %c0_i32_12 : i32
    %c0_13 = arith.constant 0 : index
    %26 = arith.index_cast %25 : i32 to index
    %c0_14 = arith.constant 0 : index
    %27 = vector.load %arg2[%c0_13, %26, %c0_14] : memref<1x434x4xf32, #tpu.memory_space<vmem>>, vector<1x192x4xf32>
    %28 = vector.shape_cast %27 : vector<1x192x4xf32> to vector<192x4xf32>
    %c0_15 = arith.constant 0 : index
    %c12 = arith.constant 12 : index
    %29 = vector.load %arg6[%c0_15, %c12] : memref<192x36xf32, #tpu.memory_space<vmem>>, vector<192x4xf32>
    tpu.vector_store %arg6[%c0_15, %c12], %28 {strides = array<i32>} : memref<192x36xf32, #tpu.memory_space<vmem>>, vector<192x4xf32>,
    %c24_i32_16 = arith.constant 24 : i32
    %30 = arith.addi %1, %c24_i32_16 : i32
    %31 = tpu.assume_multiple %30, 8 : i32
    %c1_i32_17 = arith.constant 1 : i32
    %32 = arith.addi %31, %c1_i32_17 : i32
    %c0_18 = arith.constant 0 : index
    %33 = arith.index_cast %32 : i32 to index
    %c0_19 = arith.constant 0 : index
    %34 = vector.load %arg2[%c0_18, %33, %c0_19] : memref<1x434x4xf32, #tpu.memory_space<vmem>>, vector<1x192x4xf32>
    %35 = vector.shape_cast %34 : vector<1x192x4xf32> to vector<192x4xf32>
    %c0_20 = arith.constant 0 : index
    %c16 = arith.constant 16 : index
    %36 = vector.load %arg6[%c0_20, %c16] : memref<192x36xf32, #tpu.memory_space<vmem>>, vector<192x4xf32>
    tpu.vector_store %arg6[%c0_20, %c16], %35 {strides = array<i32>} : memref<192x36xf32, #tpu.memory_space<vmem>>, vector<192x4xf32>,
    %c24_i32_21 = arith.constant 24 : i32
    %37 = arith.addi %1, %c24_i32_21 : i32
    %38 = tpu.assume_multiple %37, 8 : i32
    %c2_i32_22 = arith.constant 2 : i32
    %39 = arith.addi %38, %c2_i32_22 : i32
    %c0_23 = arith.constant 0 : index
    %40 = arith.index_cast %39 : i32 to index
    %c0_24 = arith.constant 0 : index
    %41 = vector.load %arg2[%c0_23, %40, %c0_24] : memref<1x434x4xf32, #tpu.memory_space<vmem>>, vector<1x192x4xf32>
    %42 = vector.shape_cast %41 : vector<1x192x4xf32> to vector<192x4xf32>
    %c0_25 = arith.constant 0 : index
    %c20 = arith.constant 20 : index
    %43 = vector.load %arg6[%c0_25, %c20] : memref<192x36xf32, #tpu.memory_space<vmem>>, vector<192x4xf32>
    tpu.vector_store %arg6[%c0_25, %c20], %42 {strides = array<i32>} : memref<192x36xf32, #tpu.memory_space<vmem>>, vector<192x4xf32>,
    %c48_i32 = arith.constant 48 : i32
    %44 = arith.addi %1, %c48_i32 : i32
    %45 = tpu.assume_multiple %44, 8 : i32
    %c0_i32_26 = arith.constant 0 : i32
    %46 = arith.addi %45, %c0_i32_26 : i32
    %c0_27 = arith.constant 0 : index
    %47 = arith.index_cast %46 : i32 to index
    %c0_28 = arith.constant 0 : index
    %48 = vector.load %arg2[%c0_27, %47, %c0_28] : memref<1x434x4xf32, #tpu.memory_space<vmem>>, vector<1x192x4xf32>
    %49 = vector.shape_cast %48 : vector<1x192x4xf32> to vector<192x4xf32>
    %c0_29 = arith.constant 0 : index
    %c24 = arith.constant 24 : index
    %50 = vector.load %arg6[%c0_29, %c24] : memref<192x36xf32, #tpu.memory_space<vmem>>, vector<192x4xf32>
    tpu.vector_store %arg6[%c0_29, %c24], %49 {strides = array<i32>} : memref<192x36xf32, #tpu.memory_space<vmem>>, vector<192x4xf32>,
    %c48_i32_30 = arith.constant 48 : i32
    %51 = arith.addi %1, %c48_i32_30 : i32
    %52 = tpu.assume_multiple %51, 8 : i32
    %c1_i32_31 = arith.constant 1 : i32
    %53 = arith.addi %52, %c1_i32_31 : i32
    %c0_32 = arith.constant 0 : index
    %54 = arith.index_cast %53 : i32 to index
    %c0_33 = arith.constant 0 : index
    %55 = vector.load %arg2[%c0_32, %54, %c0_33] : memref<1x434x4xf32, #tpu.memory_space<vmem>>, vector<1x192x4xf32>
    %56 = vector.shape_cast %55 : vector<1x192x4xf32> to vector<192x4xf32>
    %c0_34 = arith.constant 0 : index
    %c28 = arith.constant 28 : index
    %57 = vector.load %arg6[%c0_34, %c28] : memref<192x36xf32, #tpu.memory_space<vmem>>, vector<192x4xf32>
    tpu.vector_store %arg6[%c0_34, %c28], %56 {strides = array<i32>} : memref<192x36xf32, #tpu.memory_space<vmem>>, vector<192x4xf32>,
    %c48_i32_35 = arith.constant 48 : i32
    %58 = arith.addi %1, %c48_i32_35 : i32
    %59 = tpu.assume_multiple %58, 8 : i32
    %c2_i32_36 = arith.constant 2 : i32
    %60 = arith.addi %59, %c2_i32_36 : i32
    %c0_37 = arith.constant 0 : index
    %61 = arith.index_cast %60 : i32 to index
    %c0_38 = arith.constant 0 : index
    %62 = vector.load %arg2[%c0_37, %61, %c0_38] : memref<1x434x4xf32, #tpu.memory_space<vmem>>, vector<1x192x4xf32>
    %63 = vector.shape_cast %62 : vector<1x192x4xf32> to vector<192x4xf32>
    %c0_39 = arith.constant 0 : index
    %c32 = arith.constant 32 : index
    %64 = vector.load %arg6[%c0_39, %c32] : memref<192x36xf32, #tpu.memory_space<vmem>>, vector<192x4xf32>
    tpu.vector_store %arg6[%c0_39, %c32], %63 {strides = array<i32>} : memref<192x36xf32, #tpu.memory_space<vmem>>, vector<192x4xf32>,
    %c0_40 = arith.constant 0 : index
    %c0_41 = arith.constant 0 : index
    %65 = vector.load %arg6[%c0_40, %c0_41] : memref<192x36xf32, #tpu.memory_space<vmem>>, vector<192x36xf32>
    %c0_42 = arith.constant 0 : index
    %c0_43 = arith.constant 0 : index
    %66 = vector.load %arg3[%c0_42, %c0_43] : memref<36x128xf32, #tpu.memory_space<vmem>>, vector<36x128xf32>
    %cst = arith.constant dense<0.000000e+00> : vector<192x128xf32>
    %67 = tpu.matmul %65, %66, %cst {dimension_numbers = #tpu.dot_dimension_numbers<[1], [0], [0], [1], [0, 0, 1, 1], [], []>} : vector<192x36xf32>, vector<36x128xf32>, vector<192x128xf32> -> vector<192x128xf32>
    %c0_44 = arith.constant 0 : index
    %c0_45 = arith.constant 0 : index
    %68 = vector.load %arg4[%c0_44, %c0_45] : memref<1x128xf32, #tpu.memory_space<vmem>>, vector<1x128xf32>
    %69 = vector.broadcast %68 : vector<1x128xf32> to vector<192x128xf32>
    %70 = arith.addf %67, %69 : vector<192x128xf32>
    %cst_46 = arith.constant 0.000000e+00 : f32
    %71 = vector.broadcast %cst_46 : f32 to vector<192x128xf32>
    %72 = arith.maximumf %70, %71 : vector<192x128xf32>
    %c0_47 = arith.constant 0 : index
    %c0_48 = arith.constant 0 : index
    %c0_49 = arith.constant 0 : index
    %73 = vector.load %arg5[%c0_47, %c0_48, %c0_49] : memref<1x192x128xf32, #tpu.memory_space<vmem>>, vector<1x192x128xf32>
    %74 = vector.shape_cast %73 : vector<1x192x128xf32> to vector<192x128xf32>
    %75 = vector.shape_cast %72 : vector<192x128xf32> to vector<1x192x128xf32>
    tpu.vector_store %arg5[%c0_47, %c0_48, %c0_49], %75 {strides = array<i32>} : memref<1x192x128xf32, #tpu.memory_space<vmem>>, vector<1x192x128xf32>,
    return
  }
  func.func @transform_0(%arg0: i32, %arg1: i32) -> (i32, i32, i32) {
    %c0_i32 = arith.constant 0 : i32
    %c0_i32_0 = arith.constant 0 : i32
    %c0_i32_1 = arith.constant 0 : i32
    return %arg0, %c0_i32, %c0_i32_0 : i32, i32, i32
  }
  func.func @transform_1(%arg0: i32, %arg1: i32) -> (i32, i32) {
    %c0_i32 = arith.constant 0 : i32
    %c0_i32_0 = arith.constant 0 : i32
    %c0_i32_1 = arith.constant 0 : i32
    return %c0_i32, %c0_i32_0 : i32, i32
  }
  func.func @transform_2(%arg0: i32, %arg1: i32) -> (i32, i32) {
    %c0_i32 = arith.constant 0 : i32
    %c0_i32_0 = arith.constant 0 : i32
    %c0_i32_1 = arith.constant 0 : i32
    return %c0_i32, %c0_i32_0 : i32, i32
  }
  func.func @transform_3(%arg0: i32, %arg1: i32) -> (i32, i32, i32) {
    %c0_i32 = arith.constant 0 : i32
    %c0_i32_0 = arith.constant 0 : i32
    return %arg0, %arg1, %c0_i32 : i32, i32, i32
  }
}

</mosaic_0001>

<bundles_post_ra>
// kernel: tpu_custom_call.1
= control target key start
LH: loop header
LB: loop body
LE: loop exit
PB: predicated region body
PF: predicated region fallthrough
CT: control target
= control target key end

     0   :  { %8 = vsyncpa [#allocation4], 0  ;;  %s3426_s0 = inlined_call_operand.vmem [shape: f32[2,434,4], index: 0, kind: input, shape index: {}]   ;;  %s3427_s1 = inlined_call_operand.vmem [shape: f32[36,128], index: 1, kind: input, shape index: {}]   ;;  %s3428_s2 = inlined_call_operand.vmem [shape: f32[1,128], index: 2, kind: input, shape index: {}]   ;;  %s3429_s3 = inlined_call_operand.hbm [shape: f32[2,384,128], index: 3, kind: output, shape index: {}]  }
   0x1   :  { %10 = vsyncpa [#allocation4 + $0x1], 0  ;;  %s2394_s12 = smov 0   ;;  %s2396_s13 = smov 0  }
   0x2   :  { %s2398_s14 = smov 0   ;;  %s2400_s15 = smov 0  }
   0x3   :  { %s2402_s16 = smov 0   ;;  %s2404_s17 = smov 0  }
   0x4   :  { %s2406_s18 = smov 0   ;;  %s2408_s19 = smov 0  }
   0x5 LB: > { %s1875_s20 = sadd.s32 4294967295, %s2362_s19   ;;  %s1876_s21 = sadd.s32 4294967294, %s2362_s19   ;;  %s2362_s19 = sphi %s2408_s19, %s16_s19   ;;  %s2358_s18 = sphi %s2406_s18, %s3438_s18   ;;  %s2354_s17 = sphi %s2404_s17, %s3437_s17   ;;  %s2350_s16 = sphi %s2402_s16, %s3436_s16   ;;  %s2346_s15 = sphi %s2400_s15, %s3435_s15   ;;  %s2342_s14 = sphi %s2398_s14, %s3434_s14   ;;  %s2338_s13 = sphi %s2396_s13, %s3433_s13   ;;  %s2334_s12 = sphi %s2394_s12, %s3432_s12  }
   0x6   : > { %s25_s22 = sadd.s32 1, %s2354_s17  ;;  %s28_s23 = sadd.s32 1, %s2358_s18 }
   0x7   : > { %p26_p0 = scmp.ge.s32.totalorder %s25_s22, 2  ;;  %p115_p1 = scmp.ne.s32.totalorder %s2342_s14, %s2338_s13 }
   0x8   : > { %p116_p2 = scmp.eq.s32.totalorder %s1875_s20, 3  ;;  %p121_p5 = scmp.ne.s32.totalorder %s2338_s13, %s2334_s12 }
   0x9   : > { %s3440_s22 = smov (%p26_p0, %s25_s22), 0  ;;  %s3442_s23 = smov (!%p26_p0, %s28_s23), %s2358_s18 }
   0xa   : > { %s101_s24 = ssub.s32 %s2354_s17, %s3440_s22  ;;  %p2445_p3 = por %p116_p2, %p115_p1 }
   0xb   : > { %p30_p4 = scmp.ge.s32.totalorder %s3442_s23, 2  ;;  %p122_p6 = scmp.eq.s32.totalorder %s1876_s21, 3 }
   0xc   : > { %p1879_p7 = scmp.ge.s32.totalorder %s2362_s19, 1  ;;  %p154_p9 = scmp.lt.s32.totalorder %s2362_s19, 5 }
   0xd   : > { %s3444_s23 = smov (%p30_p4, %s3442_s23), 0  ;;  %p2454_p8 = por %p122_p6, %p121_p5 }
   0xe   : > { %s100_s27 = ssub.s32 %s2358_s18, %s3444_s23  ;;  %s105_s28 = sadd.s32 1, %s2342_s14 }
   0xf   : > { %s102_s29 = sor.u32 %s101_s24, %s100_s27  ;;  %p155_p10 = pnand %p1879_p7, %p154_p9 }
  0x10   : > { %p103_p11 = scmp.eq.s32.totalorder %s102_s29, 0  ;;  %p178_p12 = scmp.lt.s32.totalorder (!%p155_p10), %s2350_s16, 1 }
  0x11   : > { %158 = sbr.rel (%p155_p10) target bundleno = 746 (0x2ea), region = 32  ;;  %s2364_s11 = smov (!%p155_p10), 4  }
  0x12   : > { %s2463_s30 = scalar_select %p103_p11, %s2342_s14, %s105_s28  }
  0x13   : > { %s184_s5 = smul.u32 (!%p155_p10), 192, %s2346_s15  ;;  %s2365_s20 = smov (!%p155_p10), 8  }
  0x14   : > { %s2366_s21 = smov (!%p155_p10), 12   ;;  %s2367_s24 = smov (!%p155_p10), 16  }
  0x15   : > { %s2368_s27 = smov (!%p155_p10), 20   ;;  %s2369_s28 = smov (!%p155_p10), 24  }
  0x16   : > { %s179_s4 = scalar_select %p178_p12, %s2350_s16, 1  ;;  %vm210_vm0 = vcmask 31744   ;;  %vm357_vm1 = vcmask 64544   ;;  %vm1520_vm2 = vcmask 1043456   ;;  %vm504_vm3 = vcmask 97344  }
  0x17   : > { %s2370_s29 = smov 28   ;;  %s2371_s8 = smov 32   ;;  %vm651_vm4 = vcmask 130144   ;;  %vm798_vm5 = vcmask 162944   ;;  %vm945_vm6 = vcmask 195744   ;;  %vm1092_vm7 = vcmask 228544  }
  0x18   : > { %s2188_s6 = smul.u32 440, %s179_s4  ;;  %vm1239_vm8 = vcmask 261344   ;;  %vm1386_vm9 = vcmask 294144   ;;  %vm1447_vm10 = vcmask 293888  }
  0x1a   : > { %s182_s9 = scalar_lea.vmem %s3426_s0, %s2188_s6 }
  0x1b   : > { %s2471_s10 = scalar_lea.vmem %s182_s9, %s184_s5 }
  0x1c   : > { %v1883_v0 = vld [vmem:[%s2471_s10 + $0x11] sm:$0xff]  ;;  %v1881_v1 = vld [vmem:[%s2471_s10 + $0x1] sm:$0xff]  ;;  %v2478_v2 = vld [vmem:[%s2471_s10 + $0x19] sm:$0xff] }
  0x1d   : > { %289 = vrot.lane.b32.xlu1 %v1883_v0, %s2364_s11  ;;  %285 = vrot.lane.b32.xlu0 %v1881_v1, %s2364_s11  ;;  %v1882_v3 = vld [vmem:[%s2471_s10 + $0x9] sm:$0xff]  ;;  %v2488_v5 = vld [vmem:[%s2471_s10 + $0x21] sm:$0xff] }
  0x1e   : > { %v2485_v4 = vld [vmem:[%s2471_s10 + $0x29] sm:$0xff]  ;;  %v2495_v6 = vld [vmem:[%s2471_s10 + $0x39] sm:$0xff]  ;;  %v2498_v7 = vld [vmem:[%s2471_s10 + $0x31] sm:$0xff] }
  0x1f   : > { %v2505_v8 = vld [vmem:[%s2471_s10 + $0x49] sm:$0xff]  ;;  %v2508_v9 = vld [vmem:[%s2471_s10 + $0x41] sm:$0xff]  ;;  %v2511_v10 = vld [vmem:[%s2471_s10 + $0x59] sm:$0xff] }
  0x20   : > { %v2514_v11 = vld [vmem:[%s2471_s10 + $0x51] sm:$0xff]  ;;  %v2527_v14 = vld [vmem:[%s2471_s10 + $0x80] sm:$0xff]  ;;  %v187_v20 = vld [vmem:[%s2471_s10 + $0x8] sm:$0xff] }
  0x21   : > { %291 = vrot.lane.b32.xlu1 %v2478_v2, %s2364_s11  ;;  %287 = vrot.lane.b32.xlu0 %v1882_v3, %s2364_s11  ;;  %v2517_v12 = vld [vmem:[%s2471_s10 + $0x78] sm:$0xff]  ;;  %v2532_v15 = vld [vmem:[%s2471_s10 + $0x20] sm:$0xff]  ;;  %227 = vst.msk [vmem:[#allocation2 + $0x80] sm:$0xff] %vm210_vm0, %v2527_v14  ;;  %212 = vst.msk [vmem:[#allocation2 + $0x8] sm:$0xff] %vm210_vm0, %v187_v20 }
  0x22   : > { %v2524_v13 = vld [vmem:[%s2471_s10 + $0x18] sm:$0xff]  ;;  %226 = vst.msk [vmem:[#allocation2 + $0x78] sm:$0xff] %vm210_vm0, %v2517_v12  ;;  %v188_v16 = vld [vmem:[%s2471_s10 + $0x10] sm:$0xff]  ;;  %v186_v17 = vld [vmem:[%s2471_s10] sm:$0xff] }
  0x23   : > { %214 = vst.msk [vmem:[#allocation2 + $0x18] sm:$0xff] %vm210_vm0, %v2524_v13  ;;  %213 = vst.msk [vmem:[#allocation2 + $0x10] sm:$0xff] %vm210_vm0, %v188_v16  ;;  %v2543_v18 = vld [vmem:[%s2471_s10 + $0x90] sm:$0xff]  ;;  %v2553_v22 = vld [vmem:[%s2471_s10 + $0x61] sm:$0xff] }
  0x24   : > { %211 = vst.msk [vmem:[#allocation2] sm:$0xff] %vm210_vm0, %v186_v17  ;;  %v2546_v19 = vld [vmem:[%s2471_s10 + $0x30] sm:$0xff]  ;;  %215 = vst.msk [vmem:[#allocation2 + $0x20] sm:$0xff] %vm210_vm0, %v2532_v15  ;;  %v2557_v23 = vld [vmem:[%s2471_s10 + $0x88] sm:$0xff] }
  0x25   : > { %295 = vrot.lane.b32.xlu1 %v2485_v4, %s2364_s11  ;;  %293 = vrot.lane.b32.xlu0 %v2488_v5, %s2364_s11  ;;  %v1894_v21 = vld [vmem:[%s2471_s10 + $0x69] sm:$0xff]  ;;  %v2563_v25 = vld [vmem:[%s2471_s10 + $0x98] sm:$0xff]  ;;  %217 = vst.msk [vmem:[#allocation2 + $0x30] sm:$0xff] %vm210_vm0, %v2546_v19  ;;  %229 = vst.msk [vmem:[#allocation2 + $0x90] sm:$0xff] %vm210_vm0, %v2543_v18 }
  0x26   : > { %v2560_v24 = vld [vmem:[%s2471_s10 + $0x28] sm:$0xff]  ;;  %v2576_v26 = vld [vmem:[%s2471_s10 + $0x38] sm:$0xff]  ;;  %228 = vst.msk [vmem:[#allocation2 + $0x88] sm:$0xff] %vm210_vm0, %v2557_v23  ;;  %230 = vst.msk [vmem:[#allocation2 + $0x98] sm:$0xff] %vm210_vm0, %v2563_v25 }
  0x27   : > { %216 = vst.msk [vmem:[#allocation2 + $0x28] sm:$0xff] %vm210_vm0, %v2560_v24  ;;  %v2579_v27 = vld [vmem:[%s2471_s10 + $0x48] sm:$0xff]  ;;  %218 = vst.msk [vmem:[#allocation2 + $0x38] sm:$0xff] %vm210_vm0, %v2576_v26  ;;  %v2590_v28 = vld [vmem:[%s2471_s10 + $0x40] sm:$0xff] }
  0x28   : > { %220 = vst.msk [vmem:[#allocation2 + $0x48] sm:$0xff] %vm210_vm0, %v2579_v27  ;;  %v2593_v29 = vld [vmem:[%s2471_s10 + $0x58] sm:$0xff]  ;;  %v2596_v30 = vld [vmem:[%s2471_s10 + $0x50] sm:$0xff]  ;;  %219 = vst.msk [vmem:[#allocation2 + $0x40] sm:$0xff] %vm210_vm0, %v2590_v28 }
  0x29   : > { %299 = vrot.lane.b32.xlu1 %v2495_v6, %s2364_s11  ;;  %297 = vrot.lane.b32.xlu0 %v2498_v7, %s2364_s11  ;;  %222 = vst.msk [vmem:[#allocation2 + $0x58] sm:$0xff] %vm210_vm0, %v2593_v29  ;;  %221 = vst.msk [vmem:[#allocation2 + $0x50] sm:$0xff] %vm210_vm0, %v2596_v30  ;;  %v2605_v31 = vld [vmem:[%s2471_s10 + $0x68] sm:$0xff]  ;;  %v2608_v32 = vld [vmem:[%s2471_s10 + $0x60] sm:$0xff] }
  0x2a   : > { %v2611_v33 = vld [vmem:[%s2471_s10 + $0x70] sm:$0xff]  ;;  %224 = vst.msk [vmem:[#allocation2 + $0x68] sm:$0xff] %vm210_vm0, %v2605_v31  ;;  %223 = vst.msk [vmem:[#allocation2 + $0x60] sm:$0xff] %vm210_vm0, %v2608_v32  ;;  %v2623_v34 = vld [vmem:[%s2471_s10 + $0x79] sm:$0xff] }
  0x2b   : > { %225 = vst.msk [vmem:[#allocation2 + $0x70] sm:$0xff] %vm210_vm0, %v2611_v33  ;;  %v1895_v35 = vld [vmem:[%s2471_s10 + $0x71] sm:$0xff]  ;;  %v2627_v36 = vld [vmem:[%s2471_s10 + $0xa8] sm:$0xff]  ;;  %v2630_v37 = vld [vmem:[%s2471_s10 + $0xa0] sm:$0xff] }
  0x2c   : > { %232 = vst.msk [vmem:[#allocation2 + $0xa8] sm:$0xff] %vm210_vm0, %v2627_v36  ;;  %231 = vst.msk [vmem:[#allocation2 + $0xa0] sm:$0xff] %vm210_vm0, %v2630_v37  ;;  %v2640_v38 = vld [vmem:[%s2471_s10 + $0x89] sm:$0xff]  ;;  %v2643_v39 = vld [vmem:[%s2471_s10 + $0x81] sm:$0xff] }
  0x2d   : > { %303 = vrot.lane.b32.xlu1 %v2505_v8, %s2364_s11  ;;  %301 = vrot.lane.b32.xlu0 %v2508_v9, %s2364_s11  ;;  %v2646_v40 = vld [vmem:[%s2471_s10 + $0xb8] sm:$0xff]  ;;  %v2649_v41 = vld [vmem:[%s2471_s10 + $0xb0] sm:$0xff] }
  0x2e   : > { %234 = vst.msk [vmem:[#allocation2 + $0xb8] sm:$0xff] %vm210_vm0, %v2646_v40  ;;  %233 = vst.msk [vmem:[#allocation2 + $0xb0] sm:$0xff] %vm210_vm0, %v2649_v41  ;;  %v2660_v42 = vld [vmem:[%s2471_s10 + $0x99] sm:$0xff]  ;;  %v2663_v43 = vld [vmem:[%s2471_s10 + $0x91] sm:$0xff] }
  0x2f   : > { %v2670_v44 = vld [vmem:[%s2471_s10 + $0xa9] sm:$0xff]  ;;  %v2673_v45 = vld [vmem:[%s2471_s10 + $0xa1] sm:$0xff]  ;;  %v2680_v46 = vld [vmem:[%s2471_s10 + $0xb9] sm:$0xff] }
  0x30   : > { %v2683_v47 = vld [vmem:[%s2471_s10 + $0xb1] sm:$0xff]  ;;  %v1905_v49 = vld [vmem:[%s2471_s10 + $0x2] sm:$0xff]  ;;  %v1908_v50 = vld [vmem:[%s2471_s10 + $0x1a] sm:$0xff] }
  0x31   : > { %307 = vrot.lane.b32.xlu1 %v2511_v10, %s2364_s11  ;;  %305 = vrot.lane.b32.xlu0 %v2514_v11, %s2364_s11  ;;  %v1906_v48 = vld [vmem:[%s2471_s10 + $0xa] sm:$0xff]  ;;  %v1907_v51 = vld [vmem:[%s2471_s10 + $0x12] sm:$0xff] }
  0x32   : > { %v2698_v52 = vld [vmem:[%s2471_s10 + $0x2a] sm:$0xff]  ;;  %v1909_v53 = vld [vmem:[%s2471_s10 + $0x22] sm:$0xff]  ;;  %v2705_v54 = vld [vmem:[%s2471_s10 + $0x3a] sm:$0xff] }
  0x33   : > { %v2708_v55 = vld [vmem:[%s2471_s10 + $0x32] sm:$0xff]  ;;  %v2715_v56 = vld [vmem:[%s2471_s10 + $0x4a] sm:$0xff]  ;;  %v2718_v57 = vld [vmem:[%s2471_s10 + $0x42] sm:$0xff] }
  0x34   : > { %v2725_v58 = vld [vmem:[%s2471_s10 + $0x5a] sm:$0xff]  ;;  %v2728_v59 = vld [vmem:[%s2471_s10 + $0x52] sm:$0xff]  ;;  %v1918_v60 = vld [vmem:[%s2471_s10 + $0x6a] sm:$0xff] }
  0x35   : > { %311 = vrot.lane.b32.xlu1 %v1894_v21, %s2364_s11  ;;  %309 = vrot.lane.b32.xlu0 %v2553_v22, %s2364_s11  ;;  %v2736_v61 = vld [vmem:[%s2471_s10 + $0x62] sm:$0xff]  ;;  %v1920_v62 = vld [vmem:[%s2471_s10 + $0x7a] sm:$0xff] }
  0x36   : > { %v1919_v63 = vld [vmem:[%s2471_s10 + $0x72] sm:$0xff]  ;;  %v2746_v0 = vld [vmem:[%s2471_s10 + $0x8a] sm:$0xff]  ;;  %v1921_v1 = vld [vmem:[%s2471_s10 + $0x82] sm:$0xff] }
  0x37   : > { %v2753_v3 = vld [vmem:[%s2471_s10 + $0x9a] sm:$0xff]  ;;  %v2756_v16 = vld [vmem:[%s2471_s10 + $0x92] sm:$0xff]  ;;  %v2763_v17 = vld [vmem:[%s2471_s10 + $0xaa] sm:$0xff] }
  0x38   : > { %v2766_v20 = vld [vmem:[%s2471_s10 + $0xa2] sm:$0xff] }
  0x39   : > { %315 = vrot.lane.b32.xlu1 %v2623_v34, %s2364_s11  ;;  %313 = vrot.lane.b32.xlu0 %v1895_v35, %s2364_s11 }
  0x3d   : > { %319 = vrot.lane.b32.xlu1 %v2640_v38, %s2364_s11  ;;  %317 = vrot.lane.b32.xlu0 %v2643_v39, %s2364_s11 }
  0x41   : > { %323 = vrot.lane.b32.xlu1 %v2660_v42, %s2364_s11  ;;  %321 = vrot.lane.b32.xlu0 %v2663_v43, %s2364_s11 }
  0x45   : > { %327 = vrot.lane.b32.xlu1 %v2670_v44, %s2364_s11  ;;  %325 = vrot.lane.b32.xlu0 %v2673_v45, %s2364_s11 }
  0x49   : > { %331 = vrot.lane.b32.xlu1 %v2680_v46, %s2364_s11  ;;  %329 = vrot.lane.b32.xlu0 %v2683_v47, %s2364_s11 }
  0x4d   : > { %434 = vrot.lane.b32.xlu1 %v1906_v48, %s2365_s20  ;;  %432 = vrot.lane.b32.xlu0 %v1905_v49, %s2365_s20 }
  0x51   : > { %438 = vrot.lane.b32.xlu1 %v1908_v50, %s2365_s20  ;;  %436 = vrot.lane.b32.xlu0 %v1907_v51, %s2365_s20 }
  0x55   : > { %442 = vrot.lane.b32.xlu1 %v2698_v52, %s2365_s20  ;;  %440 = vrot.lane.b32.xlu0 %v1909_v53, %s2365_s20 }
  0x59   : > { %446 = vrot.lane.b32.xlu1 %v2705_v54, %s2365_s20  ;;  %444 = vrot.lane.b32.xlu0 %v2708_v55, %s2365_s20 }
  0x5d   : > { %450 = vrot.lane.b32.xlu1 %v2715_v56, %s2365_s20  ;;  %448 = vrot.lane.b32.xlu0 %v2718_v57, %s2365_s20 }
  0x61   : > { %454 = vrot.lane.b32.xlu1 %v2725_v58, %s2365_s20  ;;  %452 = vrot.lane.b32.xlu0 %v2728_v59, %s2365_s20 }
  0x65   : > { %458 = vrot.lane.b32.xlu1 %v1918_v60, %s2365_s20  ;;  %456 = vrot.lane.b32.xlu0 %v2736_v61, %s2365_s20  ;;  %v1436_v60 = vld [vmem:[%s3427_s1 + $0x8] sm:$0xff] }
  0x69   : > { %462 = vrot.lane.b32.xlu1 %v1920_v62, %s2365_s20  ;;  %460 = vrot.lane.b32.xlu0 %v1919_v63, %s2365_s20 }
  0x6d   : > { %466 = vrot.lane.b32.xlu1 %v2746_v0, %s2365_s20  ;;  %464 = vrot.lane.b32.xlu0 %v1921_v1, %s2365_s20 }
  0x71   : > { %470 = vrot.lane.b32.xlu1 %v2753_v3, %s2365_s20  ;;  %468 = vrot.lane.b32.xlu0 %v2756_v16, %s2365_s20 }
  0x75   : > { %474 = vrot.lane.b32.xlu1 %v2763_v17, %s2365_s20  ;;  %472 = vrot.lane.b32.xlu0 %v2766_v20, %s2365_s20 }
  0x79   : > { %603 = vrot.lane.b32.xlu1 %v2517_v12, %s2366_s21  ;;  %579 = vrot.lane.b32.xlu0 %v2524_v13, %s2366_s21 }
  0x7d   : > { %605 = vrot.lane.b32.xlu1 %v2527_v14, %s2366_s21  ;;  %581 = vrot.lane.b32.xlu0 %v2532_v15, %s2366_s21 }
  0x81   : > { %750 = vrot.lane.b32.xlu1 %v2623_v34, %s2367_s24  ;;  %726 = vrot.lane.b32.xlu0 %v2478_v2, %s2367_s24 }
  0x85   : > { %752 = vrot.lane.b32.xlu1 %v2643_v39, %s2367_s24  ;;  %728 = vrot.lane.b32.xlu0 %v2488_v5, %s2367_s24 }
  0x89   : > { %897 = vrot.lane.b32.xlu1 %v1920_v62, %s2368_s27  ;;  %873 = vrot.lane.b32.xlu0 %v1908_v50, %s2368_s27  ;;  %v1437_v50 = vld [vmem:[%s3427_s1 + $0x10] sm:$0xff]  ;;  %v1435_v62 = vld [vmem:[%s3427_s1] sm:$0xff] }
  0x8d   : > { %899 = vrot.lane.b32.xlu1 %v1921_v1, %s2368_s27  ;;  %875 = vrot.lane.b32.xlu0 %v1909_v53, %s2368_s27 }
  0x8f   : > { %v290_v12 = vpop.permute.xlu1 %289  ;;  %v286_v13 = vpop.permute.xlu0 %285 }
  0x90   : > { %360 = vst.msk [vmem:[#allocation2 + $0x10] sm:$0xff] %vm357_vm1, %v290_v12  ;;  %358 = vst.msk [vmem:[#allocation2] sm:$0xff] %vm357_vm1, %v286_v13 }
  0x91   : > { %1044 = vrot.lane.b32.xlu1 %v2543_v18, %s2369_s28  ;;  %1020 = vrot.lane.b32.xlu0 %v2546_v19, %s2369_s28 }
  0x93   : > { %v292_v2 = vpop.permute.xlu1 %291  ;;  %v288_v5 = vpop.permute.xlu0 %287 }
  0x94   : > { %361 = vst.msk [vmem:[#allocation2 + $0x18] sm:$0xff] %vm357_vm1, %v292_v2  ;;  %359 = vst.msk [vmem:[#allocation2 + $0x8] sm:$0xff] %vm357_vm1, %v288_v5 }
  0x95   : > { %607 = vrot.lane.b32.xlu1 %v2557_v23, %s2366_s21  ;;  %583 = vrot.lane.b32.xlu0 %v2560_v24, %s2366_s21 }
  0x97   : > { %v296_v14 = vpop.permute.xlu1 %295  ;;  %v294_v15 = vpop.permute.xlu0 %293 }
  0x98   : > { %363 = vst.msk [vmem:[#allocation2 + $0x28] sm:$0xff] %vm357_vm1, %v296_v14  ;;  %362 = vst.msk [vmem:[#allocation2 + $0x20] sm:$0xff] %vm357_vm1, %v294_v15 }
  0x99   : > { %1046 = vrot.lane.b32.xlu1 %v2563_v25, %s2369_s28  ;;  %1022 = vrot.lane.b32.xlu0 %v2576_v26, %s2369_s28 }
  0x9b   : > { %v300_v21 = vpop.permute.xlu1 %299  ;;  %v298_v34 = vpop.permute.xlu0 %297 }
  0x9c   : > { %365 = vst.msk [vmem:[#allocation2 + $0x38] sm:$0xff] %vm357_vm1, %v300_v21  ;;  %364 = vst.msk [vmem:[#allocation2 + $0x30] sm:$0xff] %vm357_vm1, %v298_v34 }
  0x9d   : > { %1191 = vrot.lane.b32.xlu1 %v2663_v43, %s2370_s29  ;;  %1167 = vrot.lane.b32.xlu0 %v2498_v7, %s2370_s29 }
  0x9f   : > { %v304_v23 = vpop.permute.xlu1 %303  ;;  %v302_v24 = vpop.permute.xlu0 %301 }
  0xa0   : > { %367 = vst.msk [vmem:[#allocation2 + $0x48] sm:$0xff] %vm357_vm1, %v304_v23  ;;  %366 = vst.msk [vmem:[#allocation2 + $0x40] sm:$0xff] %vm357_vm1, %v302_v24 }
  0xa1   : > { %609 = vrot.lane.b32.xlu1 %v2543_v18, %s2366_s21  ;;  %585 = vrot.lane.b32.xlu0 %v2546_v19, %s2366_s21  ;;  %v1439_v18 = vld [vmem:[%s3427_s1 + $0x20] sm:$0xf] }
  0xa2   : > { %2131 = vmatprep.subr.msk.mxu0 %vm1520_vm2, %v1439_v18  ;;  %2177 = vmatprep.subr.msk.mxu1 %vm1520_vm2, %v1439_v18 }
  0xa3   : > { %v308_v35 = vpop.permute.xlu1 %307  ;;  %v306_v39 = vpop.permute.xlu0 %305  ;;  %2132 = vmatpush3.msk.msra.mxu0 %vm1520_vm2, %v1439_v18  ;;  %2182 = vmatpush3.msk.msra.mxu1 %vm1520_vm2, %v1439_v18 }
  0xa4   : > { %369 = vst.msk [vmem:[#allocation2 + $0x58] sm:$0xff] %vm357_vm1, %v308_v35  ;;  %368 = vst.msk [vmem:[#allocation2 + $0x50] sm:$0xff] %vm357_vm1, %v306_v39 }
  0xa5   : > { %754 = vrot.lane.b32.xlu1 %v2640_v38, %s2367_s24  ;;  %730 = vrot.lane.b32.xlu0 %v2485_v4, %s2367_s24  ;;  %v1438_v38 = vld [vmem:[%s3427_s1 + $0x18] sm:$0xff] }
  0xa6   : > { %2133 = vmatprep.subr.mxu0 %v1438_v38  ;;  %2178 = vmatprep.subr.mxu1 %v1438_v38 }
  0xa7   : > { %v312_v48 = vpop.permute.xlu1 %311  ;;  %v310_v49 = vpop.permute.xlu0 %309  ;;  %2134 = vmatpush3.msra.mxu0 %v1438_v38  ;;  %2183 = vmatpush3.msra.mxu1 %v1438_v38 }
  0xa8   : > { %371 = vst.msk [vmem:[#allocation2 + $0x68] sm:$0xff] %vm357_vm1, %v312_v48  ;;  %370 = vst.msk [vmem:[#allocation2 + $0x60] sm:$0xff] %vm357_vm1, %v310_v49  ;;  %2135 = vmatprep.subr.mxu0 %v1437_v50  ;;  %2179 = vmatprep.subr.mxu1 %v1437_v50 }
  0xa9   : > { %1193 = vrot.lane.b32.xlu1 %v2660_v42, %s2370_s29  ;;  %1169 = vrot.lane.b32.xlu0 %v2495_v6, %s2370_s29 }
  0xaa   : > { %2136 = vmatpush3.msra.mxu0 %v1437_v50  ;;  %2184 = vmatpush3.msra.mxu1 %v1437_v50 }
  0xab   : > { %v316_v4 = vpop.permute.xlu1 %315  ;;  %v314_v19 = vpop.permute.xlu0 %313  ;;  %2137 = vmatprep.subr.mxu0 %v1436_v60  ;;  %2180 = vmatprep.subr.mxu1 %v1436_v60 }
  0xac   : > { %373 = vst.msk [vmem:[#allocation2 + $0x78] sm:$0xff] %vm357_vm1, %v316_v4  ;;  %372 = vst.msk [vmem:[#allocation2 + $0x70] sm:$0xff] %vm357_vm1, %v314_v19  ;;  %2138 = vmatpush3.msra.mxu0 %v1436_v60  ;;  %2185 = vmatpush3.msra.mxu1 %v1436_v60 }
  0xad   : > { %1338 = vrot.lane.b32.xlu1 %v2756_v16, %s2371_s8  ;;  %1314 = vrot.lane.b32.xlu0 %v2708_v55, %s2371_s8 }
  0xae   : > { %2139 = vmatprep.subr.mxu0 %v1435_v62  ;;  %2181 = vmatprep.subr.mxu1 %v1435_v62 }
  0xaf   : > { %v320_v51 = vpop.permute.xlu1 %319  ;;  %v318_v53 = vpop.permute.xlu0 %317  ;;  %2140 = vmatpush3.msra.mxu0 %v1435_v62  ;;  %2186 = vmatpush3.msra.mxu1 %v1435_v62 }
  0xb0   : > { %375 = vst.msk [vmem:[#allocation2 + $0x88] sm:$0xff] %vm357_vm1, %v320_v51  ;;  %374 = vst.msk [vmem:[#allocation2 + $0x80] sm:$0xff] %vm357_vm1, %v318_v53 }
  0xb1   : > { %756 = vrot.lane.b32.xlu1 %v2663_v43, %s2367_s24  ;;  %732 = vrot.lane.b32.xlu0 %v2498_v7, %s2367_s24 }
  0xb3   : > { %v324_v63 = vpop.permute.xlu1 %323  ;;  %v322_v1 = vpop.permute.xlu0 %321 }
  0xb4   : > { %377 = vst.msk [vmem:[#allocation2 + $0x98] sm:$0xff] %vm357_vm1, %v324_v63  ;;  %376 = vst.msk [vmem:[#allocation2 + $0x90] sm:$0xff] %vm357_vm1, %v322_v1  ;;  %v3015_v1 = vld [vmem:[%s2471_s10 + $0xba] sm:$0xff] }
  0xb5   : > { %901 = vrot.lane.b32.xlu1 %v2746_v0, %s2368_s27  ;;  %877 = vrot.lane.b32.xlu0 %v2698_v52, %s2368_s27 }
  0xb7   : > { %v328_v7 = vpop.permute.xlu1 %327  ;;  %v326_v43 = vpop.permute.xlu0 %325 }
  0xb8   : > { %379 = vst.msk [vmem:[#allocation2 + $0xa8] sm:$0xff] %vm357_vm1, %v328_v7  ;;  %378 = vst.msk [vmem:[#allocation2 + $0xa0] sm:$0xff] %vm357_vm1, %v326_v43 }
  0xb9   : > { %1340 = vrot.lane.b32.xlu1 %v2753_v3, %s2371_s8  ;;  %1316 = vrot.lane.b32.xlu0 %v2705_v54, %s2371_s8 }
  0xbb   : > { %v332_v12 = vpop.permute.xlu1 %331  ;;  %v330_v13 = vpop.permute.xlu0 %329 }
  0xbc   : > { %381 = vst.msk [vmem:[#allocation2 + $0xb8] sm:$0xff] %vm357_vm1, %v332_v12  ;;  %380 = vst.msk [vmem:[#allocation2 + $0xb0] sm:$0xff] %vm357_vm1, %v330_v13 }
  0xbd   : > { %903 = vrot.lane.b32.xlu1 %v2756_v16, %s2368_s27  ;;  %879 = vrot.lane.b32.xlu0 %v2708_v55, %s2368_s27 }
  0xbf   : > { %v435_v52 = vpop.permute.xlu1 %434  ;;  %v433_v0 = vpop.permute.xlu0 %432 }
  0xc0   : > { %506 = vst.msk [vmem:[#allocation2 + $0x8] sm:$0xff] %vm504_vm3, %v435_v52  ;;  %505 = vst.msk [vmem:[#allocation2] sm:$0xff] %vm504_vm3, %v433_v0 }
  0xc1   : > { %1048 = vrot.lane.b32.xlu1 %v2630_v37, %s2369_s28  ;;  %1024 = vrot.lane.b32.xlu0 %v2590_v28, %s2369_s28 }
  0xc3   : > { %v439_v2 = vpop.permute.xlu1 %438  ;;  %v437_v5 = vpop.permute.xlu0 %436 }
  0xc4   : > { %508 = vst.msk [vmem:[#allocation2 + $0x18] sm:$0xff] %vm504_vm3, %v439_v2  ;;  %507 = vst.msk [vmem:[#allocation2 + $0x10] sm:$0xff] %vm504_vm3, %v437_v5 }
  0xc5   : > { %611 = vrot.lane.b32.xlu1 %v2563_v25, %s2366_s21  ;;  %587 = vrot.lane.b32.xlu0 %v2576_v26, %s2366_s21 }
  0xc7   : > { %v443_v55 = vpop.permute.xlu1 %442  ;;  %v441_v16 = vpop.permute.xlu0 %440 }
  0xc8   : > { %510 = vst.msk [vmem:[#allocation2 + $0x28] sm:$0xff] %vm504_vm3, %v443_v55  ;;  %509 = vst.msk [vmem:[#allocation2 + $0x20] sm:$0xff] %vm504_vm3, %v441_v16 }
  0xc9   : > { %1050 = vrot.lane.b32.xlu1 %v2627_v36, %s2369_s28  ;;  %1026 = vrot.lane.b32.xlu0 %v2579_v27, %s2369_s28 }
  0xcb   : > { %v447_v14 = vpop.permute.xlu1 %446  ;;  %v445_v15 = vpop.permute.xlu0 %444 }
  0xcc   : > { %512 = vst.msk [vmem:[#allocation2 + $0x38] sm:$0xff] %vm504_vm3, %v447_v14  ;;  %511 = vst.msk [vmem:[#allocation2 + $0x30] sm:$0xff] %vm504_vm3, %v445_v15 }
  0xcd   : > { %1195 = vrot.lane.b32.xlu1 %v2673_v45, %s2370_s29  ;;  %1171 = vrot.lane.b32.xlu0 %v2508_v9, %s2370_s29 }
  0xcf   : > { %v451_v25 = vpop.permute.xlu1 %450  ;;  %v449_v26 = vpop.permute.xlu0 %448 }
  0xd0   : > { %514 = vst.msk [vmem:[#allocation2 + $0x48] sm:$0xff] %vm504_vm3, %v451_v25  ;;  %513 = vst.msk [vmem:[#allocation2 + $0x40] sm:$0xff] %vm504_vm3, %v449_v26  ;;  %v1961_v25 = vld [vmem:[%s2471_s10 + $0x59] sm:$0xff] }
  0xd1   : > { %613 = vrot.lane.b32.xlu1 %v2630_v37, %s2366_s21  ;;  %589 = vrot.lane.b32.xlu0 %v2590_v28, %s2366_s21 }
  0xd3   : > { %v455_v21 = vpop.permute.xlu1 %454  ;;  %v453_v34 = vpop.permute.xlu0 %452 }
  0xd4   : > { %516 = vst.msk [vmem:[#allocation2 + $0x58] sm:$0xff] %vm504_vm3, %v455_v21  ;;  %515 = vst.msk [vmem:[#allocation2 + $0x50] sm:$0xff] %vm504_vm3, %v453_v34 }
  0xd5   : > { %758 = vrot.lane.b32.xlu1 %v2660_v42, %s2367_s24  ;;  %734 = vrot.lane.b32.xlu0 %v2495_v6, %s2367_s24 }
  0xd7   : > { %v459_v23 = vpop.permute.xlu1 %458  ;;  %v457_v24 = vpop.permute.xlu0 %456 }
  0xd8   : > { %518 = vst.msk [vmem:[#allocation2 + $0x68] sm:$0xff] %vm504_vm3, %v459_v23  ;;  %517 = vst.msk [vmem:[#allocation2 + $0x60] sm:$0xff] %vm504_vm3, %v457_v24 }
  0xd9   : > { %1197 = vrot.lane.b32.xlu1 %v2670_v44, %s2370_s29  ;;  %1173 = vrot.lane.b32.xlu0 %v2505_v8, %s2370_s29 }
  0xdb   : > { %v463_v28 = vpop.permute.xlu1 %462  ;;  %v461_v37 = vpop.permute.xlu0 %460 }
  0xdc   : > { %520 = vst.msk [vmem:[#allocation2 + $0x78] sm:$0xff] %vm504_vm3, %v463_v28  ;;  %519 = vst.msk [vmem:[#allocation2 + $0x70] sm:$0xff] %vm504_vm3, %v461_v37 }
  0xdd   : > { %1342 = vrot.lane.b32.xlu1 %v2766_v20, %s2371_s8  ;;  %1318 = vrot.lane.b32.xlu0 %v2718_v57, %s2371_s8 }
  0xdf   : > { %v467_v6 = vpop.permute.xlu1 %466  ;;  %v465_v42 = vpop.permute.xlu0 %464 }
  0xe0   : > { %522 = vst.msk [vmem:[#allocation2 + $0x88] sm:$0xff] %vm504_vm3, %v467_v6  ;;  %521 = vst.msk [vmem:[#allocation2 + $0x80] sm:$0xff] %vm504_vm3, %v465_v42  ;;  %v1962_v42 = vld [vmem:[%s2471_s10 + $0x61] sm:$0xff] }
  0xe1   : > { %760 = vrot.lane.b32.xlu1 %v2673_v45, %s2367_s24  ;;  %736 = vrot.lane.b32.xlu0 %v2508_v9, %s2367_s24 }
  0xe3   : > { %v471_v35 = vpop.permute.xlu1 %470  ;;  %v469_v39 = vpop.permute.xlu0 %468 }
  0xe4   : > { %524 = vst.msk [vmem:[#allocation2 + $0x98] sm:$0xff] %vm504_vm3, %v471_v35  ;;  %523 = vst.msk [vmem:[#allocation2 + $0x90] sm:$0xff] %vm504_vm3, %v469_v39 }
  0xe5   : > { %905 = vrot.lane.b32.xlu1 %v2753_v3, %s2368_s27  ;;  %881 = vrot.lane.b32.xlu0 %v2705_v54, %s2368_s27 }
  0xe7   : > { %v475_v48 = vpop.permute.xlu1 %474  ;;  %v473_v49 = vpop.permute.xlu0 %472 }
  0xe8   : > { %526 = vst.msk [vmem:[#allocation2 + $0xa8] sm:$0xff] %vm504_vm3, %v475_v48  ;;  %525 = vst.msk [vmem:[#allocation2 + $0xa0] sm:$0xff] %vm504_vm3, %v473_v49 }
  0xe9   : > { %1344 = vrot.lane.b32.xlu1 %v2763_v17, %s2371_s8  ;;  %1320 = vrot.lane.b32.xlu0 %v2715_v56, %s2371_s8 }
  0xeb   : > { %v604_v9 = vpop.permute.xlu1 %603  ;;  %v580_v45 = vpop.permute.xlu0 %579 }
  0xec   : > { %664 = vst.msk [vmem:[#allocation2 + $0x60] sm:$0xff] %vm651_vm4, %v604_v9  ;;  %652 = vst.msk [vmem:[#allocation2] sm:$0xff] %vm651_vm4, %v580_v45  ;;  %v3104_v9 = vld [vmem:[%s2471_s10 + $0x6a] sm:$0xff] }
  0xed   : > { %907 = vrot.lane.b32.xlu1 %v2766_v20, %s2368_s27  ;;  %883 = vrot.lane.b32.xlu0 %v2718_v57, %s2368_s27 }
  0xef   : > { %v606_v54 = vpop.permute.xlu1 %605  ;;  %v582_v3 = vpop.permute.xlu0 %581 }
  0xf0   : > { %665 = vst.msk [vmem:[#allocation2 + $0x68] sm:$0xff] %vm651_vm4, %v606_v54  ;;  %653 = vst.msk [vmem:[#allocation2 + $0x8] sm:$0xff] %vm651_vm4, %v582_v3  ;;  %v1986_v3 = vld [vmem:[%s2471_s10 + $0x62] sm:$0xff] }
  0xf1   : > { %1052 = vrot.lane.b32.xlu1 %v2649_v41, %s2369_s28  ;;  %1028 = vrot.lane.b32.xlu0 %v2596_v30, %s2369_s28 }
  0xf3   : > { %v751_v18 = vpop.permute.xlu1 %750  ;;  %v727_v4 = vpop.permute.xlu0 %726 }
  0xf4   : > { %811 = vst.msk [vmem:[#allocation2 + $0x60] sm:$0xff] %vm798_vm5, %v751_v18  ;;  %799 = vst.msk [vmem:[#allocation2] sm:$0xff] %vm798_vm5, %v727_v4 }
  0xf5   : > { %615 = vrot.lane.b32.xlu1 %v2627_v36, %s2366_s21  ;;  %591 = vrot.lane.b32.xlu0 %v2579_v27, %s2366_s21 }
  0xf7   : > { %v753_v57 = vpop.permute.xlu1 %752  ;;  %v729_v20 = vpop.permute.xlu0 %728 }
  0xf8   : > { %812 = vst.msk [vmem:[#allocation2 + $0x68] sm:$0xff] %vm798_vm5, %v753_v57  ;;  %800 = vst.msk [vmem:[#allocation2 + $0x8] sm:$0xff] %vm798_vm5, %v729_v20  ;;  %v2021_v20 = vld [vmem:[%s2471_s10 + $0xd0] sm:$0xff] }
  0xf9   : > { %1054 = vrot.lane.b32.xlu1 %v2646_v40, %s2369_s28  ;;  %1030 = vrot.lane.b32.xlu0 %v2593_v29, %s2369_s28 }
  0xfb   : > { %v898_v19 = vpop.permute.xlu1 %897  ;;  %v874_v38 = vpop.permute.xlu0 %873 }
  0xfc   : > { %958 = vst.msk [vmem:[#allocation2 + $0x60] sm:$0xff] %vm945_vm6, %v898_v19  ;;  %946 = vst.msk [vmem:[#allocation2] sm:$0xff] %vm945_vm6, %v874_v38 }
  0xfd   : > { %1199 = vrot.lane.b32.xlu1 %v2683_v47, %s2370_s29  ;;  %1175 = vrot.lane.b32.xlu0 %v2514_v11, %s2370_s29 }
  0xff   : > { %v900_v27 = vpop.permute.xlu1 %899  ;;  %v876_v36 = vpop.permute.xlu0 %875 }
 0x100   : > { %959 = vst.msk [vmem:[#allocation2 + $0x68] sm:$0xff] %vm945_vm6, %v900_v27  ;;  %947 = vst.msk [vmem:[#allocation2 + $0x8] sm:$0xff] %vm945_vm6, %v876_v36 }
 0x101   : > { %617 = vrot.lane.b32.xlu1 %v2649_v41, %s2366_s21  ;;  %593 = vrot.lane.b32.xlu0 %v2596_v30, %s2366_s21  ;;  %v2994_v30 = vld [vmem:[%s2471_s10 + $0xb2] sm:$0xff] }
 0x103   : > { %v1045_v50 = vpop.permute.xlu1 %1044  ;;  %v1021_v51 = vpop.permute.xlu0 %1020 }
 0x104   : > { %1105 = vst.msk [vmem:[#allocation2 + $0x60] sm:$0xff] %vm1092_vm7, %v1045_v50  ;;  %1093 = vst.msk [vmem:[#allocation2] sm:$0xff] %vm1092_vm7, %v1021_v51 }
 0x105   : > { %762 = vrot.lane.b32.xlu1 %v2670_v44, %s2367_s24  ;;  %738 = vrot.lane.b32.xlu0 %v2505_v8, %s2367_s24 }
 0x107   : > { %v608_v53 = vpop.permute.xlu1 %607  ;;  %v584_v60 = vpop.permute.xlu0 %583 }
 0x108   : > { %666 = vst.msk [vmem:[#allocation2 + $0x70] sm:$0xff] %vm651_vm4, %v608_v53  ;;  %654 = vst.msk [vmem:[#allocation2 + $0x10] sm:$0xff] %vm651_vm4, %v584_v60  ;;  %v2022_v53 = vld [vmem:[%s2471_s10 + $0xd8] sm:$0xff] }
 0x109   : > { %1201 = vrot.lane.b32.xlu1 %v2680_v46, %s2370_s29  ;;  %1177 = vrot.lane.b32.xlu0 %v2511_v10, %s2370_s29  ;;  %v2010_v60 = vld [vmem:[%s2471_s10 + $0x78] sm:$0xff] }
 0x10b   : > { %v1047_v41 = vpop.permute.xlu1 %1046  ;;  %v1023_v62 = vpop.permute.xlu0 %1022 }
 0x10c   : > { %1106 = vst.msk [vmem:[#allocation2 + $0x68] sm:$0xff] %vm1092_vm7, %v1047_v41  ;;  %1094 = vst.msk [vmem:[#allocation2 + $0x8] sm:$0xff] %vm1092_vm7, %v1023_v62  ;;  %v2045_v62 = vld [vmem:[%s2471_s10 + $0xd1] sm:$0xff] }
 0x10d   : > { %1346 = vrot.lane.b32.xlu1 %v2994_v30, %s2371_s8  ;;  %1322 = vrot.lane.b32.xlu0 %v2728_v59, %s2371_s8 }
 0x10f   : > { %v1192_v8 = vpop.permute.xlu1 %1191  ;;  %v1168_v44 = vpop.permute.xlu0 %1167 }
 0x110   : > { %1252 = vst.msk [vmem:[#allocation2 + $0x60] sm:$0xff] %vm1239_vm8, %v1192_v8  ;;  %1240 = vst.msk [vmem:[#allocation2] sm:$0xff] %vm1239_vm8, %v1168_v44  ;;  %v2033_v8 = vld [vmem:[%s2471_s10 + $0x71] sm:$0xff] }
 0x111   : > { %764 = vrot.lane.b32.xlu1 %v2683_v47, %s2367_s24  ;;  %740 = vrot.lane.b32.xlu0 %v2514_v11, %s2367_s24 }
 0x113   : > { %v610_v10 = vpop.permute.xlu1 %609  ;;  %v586_v63 = vpop.permute.xlu0 %585 }
 0x114   : > { %667 = vst.msk [vmem:[#allocation2 + $0x78] sm:$0xff] %vm651_vm4, %v610_v10  ;;  %655 = vst.msk [vmem:[#allocation2 + $0x18] sm:$0xff] %vm651_vm4, %v586_v63 }
 0x115   : > { %909 = vrot.lane.b32.xlu1 %v2763_v17, %s2368_s27  ;;  %885 = vrot.lane.b32.xlu0 %v2715_v56, %s2368_s27  ;;  %v2019_v56 = vld [vmem:[%s2471_s10 + $0xc0] sm:$0xff] }
 0x117   : > { %v755_v7 = vpop.permute.xlu1 %754  ;;  %v731_v47 = vpop.permute.xlu0 %730 }
 0x118   : > { %813 = vst.msk [vmem:[#allocation2 + $0x70] sm:$0xff] %vm798_vm5, %v755_v7  ;;  %801 = vst.msk [vmem:[#allocation2 + $0x10] sm:$0xff] %vm798_vm5, %v731_v47 }
 0x119   : > { %1348 = vrot.lane.b32.xlu1 %v3015_v1, %s2371_s8  ;;  %1324 = vrot.lane.b32.xlu0 %v2725_v58, %s2371_s8 }
 0x11b   : > { %v1194_v11 = vpop.permute.xlu1 %1193  ;;  %v1170_v17 = vpop.permute.xlu0 %1169 }
 0x11c   : > { %1253 = vst.msk [vmem:[#allocation2 + $0x68] sm:$0xff] %vm1239_vm8, %v1194_v11  ;;  %1241 = vst.msk [vmem:[#allocation2 + $0x8] sm:$0xff] %vm1239_vm8, %v1170_v17  ;;  %v2046_v17 = vld [vmem:[%s2471_s10 + $0xd9] sm:$0xff] }
 0x11d   : > { %911 = vrot.lane.b32.xlu1 %v2994_v30, %s2368_s27  ;;  %887 = vrot.lane.b32.xlu0 %v2728_v59, %s2368_s27  ;;  %v3042_v59 = vld [vmem:[%s2471_s10 + $0xc8] sm:$0xff] }
 0x11f   : > { %v1339_v43 = vpop.permute.xlu1 %1338  ;;  %v1315_v12 = vpop.permute.xlu0 %1314 }
 0x120   : > { %1399 = vst.msk [vmem:[#allocation2 + $0x60] sm:$0xff] %vm1386_vm9, %v1339_v43  ;;  %1387 = vst.msk [vmem:[#allocation2] sm:$0xff] %vm1386_vm9, %v1315_v12 }
 0x121   : > { %1056 = vrot.lane.b32.xlu1 %v2019_v56, %s2369_s28  ;;  %1032 = vrot.lane.b32.xlu0 %v2608_v32, %s2369_s28 }
 0x123   : > { %v757_v13 = vpop.permute.xlu1 %756  ;;  %v733_v52 = vpop.permute.xlu0 %732 }
 0x124   : > { %814 = vst.msk [vmem:[#allocation2 + $0x78] sm:$0xff] %vm798_vm5, %v757_v13  ;;  %802 = vst.msk [vmem:[#allocation2 + $0x18] sm:$0xff] %vm798_vm5, %v733_v52  ;;  %v2057_v13 = vld [vmem:[%s2471_s10 + $0x72] sm:$0xff] }
 0x125   : > { %619 = vrot.lane.b32.xlu1 %v2646_v40, %s2366_s21  ;;  %595 = vrot.lane.b32.xlu0 %v2593_v29, %s2366_s21  ;;  %v2043_v29 = vld [vmem:[%s2471_s10 + $0xc1] sm:$0xff] }
 0x127   : > { %v902_v0 = vpop.permute.xlu1 %901  ;;  %v878_v2 = vpop.permute.xlu0 %877  ;;  %v1411_v5 = vld [vmem:[#allocation2] sm:$0xff] }
 0x128   : > { %v1423_v55 = vld [vmem:[#allocation2 + $0x60] sm:$0xff]  ;;  %960 = vst.msk [vmem:[#allocation2 + $0x70] sm:$0xff] %vm945_vm6, %v902_v0  ;;  %948 = vst.msk [vmem:[#allocation2 + $0x10] sm:$0xff] %vm945_vm6, %v878_v2  ;;  %2141 = vmatprep.mubr.msk.f32.mxu0 %vm1447_vm10, %v1411_v5 }
 0x129   : > { %2159 = vmatprep.mubr.msk.f32.mxu1 %vm1447_vm10, %v1423_v55  ;;  %1058 = vrot.lane.b32.xlu1 %v3042_v59, %s2369_s28 }
 0x12a   : > { %1034 = vrot.lane.b32.xlu0 %v2605_v31, %s2369_s28 }
 0x12b   : > { %v1341_v40 = vpop.permute.xlu1 %1340  ;;  %v1317_v16 = vpop.permute.xlu0 %1316 }
 0x12c   : > { %1400 = vst.msk [vmem:[#allocation2 + $0x68] sm:$0xff] %vm1386_vm9, %v1341_v40  ;;  %1388 = vst.msk [vmem:[#allocation2 + $0x8] sm:$0xff] %vm1386_vm9, %v1317_v16  ;;  %v2058_v40 = vld [vmem:[%s2471_s10 + $0x7a] sm:$0xff] }
 0x12d   : > { %1203 = vrot.lane.b32.xlu1 %v2043_v29, %s2370_s29 }
 0x12e   : > { %1179 = vrot.lane.b32.xlu0 %v2553_v22, %s2370_s29  ;;  %v3072_v22 = vld [vmem:[%s2471_s10 + $0xc9] sm:$0xff] }
 0x12f   : > { %v904_v14 = vpop.permute.xlu1 %903  ;;  %v880_v15 = vpop.permute.xlu0 %879 }
 0x130   : > { %961 = vst.msk [vmem:[#allocation2 + $0x78] sm:$0xff] %vm945_vm6, %v904_v14  ;;  %949 = vst.msk [vmem:[#allocation2 + $0x18] sm:$0xff] %vm945_vm6, %v880_v15 }
 0x131   : > { %621 = vrot.lane.b32.xlu1 %v2019_v56, %s2366_s21  ;;  %v2034_v56 = vld [vmem:[%s2471_s10 + $0x79] sm:$0xff] }
 0x132   : > { %597 = vrot.lane.b32.xlu0 %v2608_v32, %s2366_s21  ;;  %v3075_v32 = vld [vmem:[%s2471_s10 + $0x69] sm:$0xff] }
 0x133   : > { %v1049_v26 = vpop.permute.xlu1 %1048  ;;  %v1025_v21 = vpop.permute.xlu0 %1024  ;;  %v1412_v34 = vld [vmem:[#allocation2 + $0x8] sm:$0xff] }
 0x134   : > { %v1424_v23 = vld [vmem:[#allocation2 + $0x68] sm:$0xff]  ;;  %1107 = vst.msk [vmem:[#allocation2 + $0x70] sm:$0xff] %vm1092_vm7, %v1049_v26  ;;  %1095 = vst.msk [vmem:[#allocation2 + $0x10] sm:$0xff] %vm1092_vm7, %v1025_v21  ;;  %2142 = vmatmul.mubr.msk.f32.vlgmr.msra.gmra.mxu0 %vm1447_vm10, %v1412_v34  ;;  %v2023_v26 = vld [vmem:[%s2471_s10 + $0xe0] sm:$0xff] }
 0x135   : > { %2160 = vmatmul.mubr.msk.f32.vlgmr.msra.gmra.mxu1 %vm1447_vm10, %v1424_v23  ;;  %766 = vrot.lane.b32.xlu1 %v2680_v46, %s2367_s24  ;;  %v2067_v46 = vld [vmem:[%s2471_s10 + $0xc2] sm:$0xff] }
 0x136   : > { %742 = vrot.lane.b32.xlu0 %v1961_v25, %s2367_s24  ;;  %v2011_v21 = vld [vmem:[%s2471_s10 + $0x80] sm:$0xff] }
 0x137   : > { %v612_v24 = vpop.permute.xlu1 %611  ;;  %v588_v28 = vpop.permute.xlu0 %587 }
 0x138   : > { %668 = vst.msk [vmem:[#allocation2 + $0x80] sm:$0xff] %vm651_vm4, %v612_v24  ;;  %656 = vst.msk [vmem:[#allocation2 + $0x20] sm:$0xff] %vm651_vm4, %v588_v28 }
 0x139   : > { %1205 = vrot.lane.b32.xlu1 %v3072_v22, %s2370_s29 }
 0x13a   : > { %1181 = vrot.lane.b32.xlu0 %v3075_v32, %s2370_s29 }
 0x13b   : > { %v1051_v37 = vpop.permute.xlu1 %1050  ;;  %v1027_v6 = vpop.permute.xlu0 %1026 }
 0x13c   : > { %1108 = vst.msk [vmem:[#allocation2 + $0x78] sm:$0xff] %vm1092_vm7, %v1051_v37  ;;  %1096 = vst.msk [vmem:[#allocation2 + $0x18] sm:$0xff] %vm1092_vm7, %v1027_v6  ;;  %v2047_v6 = vld [vmem:[%s2471_s10 + $0xe1] sm:$0xff] }
 0x13d   : > { %1350 = vrot.lane.b32.xlu1 %v2067_v46, %s2371_s8 }
 0x13e   : > { %1326 = vrot.lane.b32.xlu0 %v2736_v61, %s2371_s8  ;;  %v3101_v61 = vld [vmem:[%s2471_s10 + $0xca] sm:$0xff] }
 0x13f   : > { %v1196_v35 = vpop.permute.xlu1 %1195  ;;  %v1172_v39 = vpop.permute.xlu0 %1171 }
 0x140   : > { %1254 = vst.msk [vmem:[#allocation2 + $0x70] sm:$0xff] %vm1239_vm8, %v1196_v35  ;;  %1242 = vst.msk [vmem:[#allocation2 + $0x10] sm:$0xff] %vm1239_vm8, %v1172_v39 }
 0x141   : > { %768 = vrot.lane.b32.xlu1 %v2043_v29, %s2367_s24  ;;  %v2070_v29 = vld [vmem:[%s2471_s10 + $0xda] sm:$0xff] }
 0x142   : > { %744 = vrot.lane.b32.xlu0 %v1962_v42, %s2367_s24  ;;  %v2035_v42 = vld [vmem:[%s2471_s10 + $0x81] sm:$0xff] }
 0x143   : > { %v614_v48 = vpop.permute.xlu1 %613  ;;  %v590_v49 = vpop.permute.xlu0 %589 }
 0x144   : > { %669 = vst.msk [vmem:[#allocation2 + $0x88] sm:$0xff] %vm651_vm4, %v614_v48  ;;  %657 = vst.msk [vmem:[#allocation2 + $0x28] sm:$0xff] %vm651_vm4, %v590_v49  ;;  %v2048_v48 = vld [vmem:[%s2471_s10 + $0xe9] sm:$0xff] }
 0x145   : > { %913 = vrot.lane.b32.xlu1 %v3015_v1, %s2368_s27  ;;  %v2036_v49 = vld [vmem:[%s2471_s10 + $0x89] sm:$0xff] }
 0x146   : > { %889 = vrot.lane.b32.xlu0 %v2725_v58, %s2368_s27 }
 0x147   : > { %v759_v45 = vpop.permute.xlu1 %758  ;;  %v735_v54 = vpop.permute.xlu0 %734 }
 0x148   : > { %815 = vst.msk [vmem:[#allocation2 + $0x80] sm:$0xff] %vm798_vm5, %v759_v45  ;;  %803 = vst.msk [vmem:[#allocation2 + $0x20] sm:$0xff] %vm798_vm5, %v735_v54  ;;  %v2071_v45 = vld [vmem:[%s2471_s10 + $0xe2] sm:$0xff] }
 0x149   : > { %1352 = vrot.lane.b32.xlu1 %v3101_v61, %s2371_s8  ;;  %v2059_v54 = vld [vmem:[%s2471_s10 + $0x82] sm:$0xff] }
 0x14a   : > { %1328 = vrot.lane.b32.xlu0 %v3104_v9, %s2371_s8 }
 0x14b   : > { %v1198_v18 = vpop.permute.xlu1 %1197  ;;  %v1174_v58 = vpop.permute.xlu0 %1173 }
 0x14c   : > { %1255 = vst.msk [vmem:[#allocation2 + $0x78] sm:$0xff] %vm1239_vm8, %v1198_v18  ;;  %1243 = vst.msk [vmem:[#allocation2 + $0x18] sm:$0xff] %vm1239_vm8, %v1174_v58 }
 0x14d   : > { %891 = vrot.lane.b32.xlu1 %v1986_v3, %s2368_s27 }
 0x14e   : > { %476 = vrot.lane.b32.xlu0 %v2994_v30, %s2365_s20 }
 0x14f   : > { %v1343_v4 = vpop.permute.xlu1 %1342  ;;  %v1319_v57 = vpop.permute.xlu0 %1318 }
 0x150   : > { %1401 = vst.msk [vmem:[#allocation2 + $0x70] sm:$0xff] %vm1386_vm9, %v1343_v4  ;;  %1389 = vst.msk [vmem:[#allocation2 + $0x10] sm:$0xff] %vm1386_vm9, %v1319_v57  ;;  %v2072_v57 = vld [vmem:[%s2471_s10 + $0xea] sm:$0xff] }
 0x151   : > { %1036 = vrot.lane.b32.xlu1 %v2611_v33, %s2369_s28 }
 0x152   : > { %915 = vrot.lane.b32.xlu0 %v2067_v46, %s2368_s27 }
 0x153   : > { %v761_v19 = vpop.permute.xlu1 %760  ;;  %v737_v38 = vpop.permute.xlu0 %736 }
 0x154   : > { %816 = vst.msk [vmem:[#allocation2 + $0x88] sm:$0xff] %vm798_vm5, %v761_v19  ;;  %804 = vst.msk [vmem:[#allocation2 + $0x28] sm:$0xff] %vm798_vm5, %v737_v38 }
 0x155   : > { %478 = vrot.lane.b32.xlu1 %v3015_v1, %s2365_s20 }
 0x156   : > { %1060 = vrot.lane.b32.xlu0 %v2021_v20, %s2369_s28 }
 0x157   : > { %v906_v27 = vpop.permute.xlu1 %905  ;;  %v882_v36 = vpop.permute.xlu0 %881  ;;  %v1413_v50 = vld [vmem:[#allocation2 + $0x10] sm:$0xff] }
 0x158   : > { %v1425_v51 = vld [vmem:[#allocation2 + $0x70] sm:$0xff]  ;;  %962 = vst.msk [vmem:[#allocation2 + $0x80] sm:$0xff] %vm945_vm6, %v906_v27  ;;  %950 = vst.msk [vmem:[#allocation2 + $0x20] sm:$0xff] %vm945_vm6, %v882_v36  ;;  %2144 = vmatprep.mubr.msk.f32.mxu0 %vm1447_vm10, %v1413_v50 }
 0x159   : > { %2162 = vmatprep.mubr.msk.f32.mxu1 %vm1447_vm10, %v1425_v51  ;;  %623 = vrot.lane.b32.xlu1 %v3042_v59, %s2366_s21 }
 0x15a   : > { %599 = vrot.lane.b32.xlu0 %v2605_v31, %s2366_s21 }
 0x15b   : > { %v1345_v30 = vpop.permute.xlu1 %1344  ;;  %v1321_v41 = vpop.permute.xlu0 %1320 }
 0x15c   : > { %1402 = vst.msk [vmem:[#allocation2 + $0x78] sm:$0xff] %vm1386_vm9, %v1345_v30  ;;  %1390 = vst.msk [vmem:[#allocation2 + $0x18] sm:$0xff] %vm1386_vm9, %v1321_v41 }
 0x15d   : > { %1062 = vrot.lane.b32.xlu1 %v2022_v53, %s2369_s28 }
 0x15e   : > { %1038 = vrot.lane.b32.xlu0 %v2010_v60, %s2369_s28 }
 0x15f   : > { %v908_v44 = vpop.permute.xlu1 %907  ;;  %v884_v10 = vpop.permute.xlu0 %883 }
 0x160   : > { %963 = vst.msk [vmem:[#allocation2 + $0x88] sm:$0xff] %vm945_vm6, %v908_v44  ;;  %951 = vst.msk [vmem:[#allocation2 + $0x28] sm:$0xff] %vm945_vm6, %v884_v10 }
 0x161   : > { %1207 = vrot.lane.b32.xlu1 %v2045_v62, %s2370_s29 }
 0x162   : > { %1183 = vrot.lane.b32.xlu0 %v2033_v8, %s2370_s29 }
 0x163   : > { %v1053_v31 = vpop.permute.xlu1 %1052  ;;  %v1029_v63 = vpop.permute.xlu0 %1028  ;;  %v1414_v1 = vld [vmem:[#allocation2 + $0x18] sm:$0xff] }
 0x164   : > { %v1426_v7 = vld [vmem:[#allocation2 + $0x78] sm:$0xff]  ;;  %1109 = vst.msk [vmem:[#allocation2 + $0x80] sm:$0xff] %vm1092_vm7, %v1053_v31  ;;  %1097 = vst.msk [vmem:[#allocation2 + $0x20] sm:$0xff] %vm1092_vm7, %v1029_v63  ;;  %2145 = vmatmul.mubr.msk.f32.gmra.mxu0 %vm1447_vm10, %v1414_v1 }
 0x165   : > { %2163 = vmatmul.mubr.msk.f32.gmra.mxu1 %vm1447_vm10, %v1426_v7  ;;  %625 = vrot.lane.b32.xlu1 %v2021_v20, %s2366_s21  ;;  %v2060_v20 = vld [vmem:[%s2471_s10 + $0x8a] sm:$0xff] }
 0x166   : > { %601 = vrot.lane.b32.xlu0 %v2611_v33, %s2366_s21  ;;  %v2069_v33 = vld [vmem:[%s2471_s10 + $0xd2] sm:$0xff] }
 0x167   : > { %v616_v47 = vpop.permute.xlu1 %615  ;;  %v592_v11 = vpop.permute.xlu0 %591 }
 0x168   : > { %670 = vst.msk [vmem:[#allocation2 + $0x90] sm:$0xff] %vm651_vm4, %v616_v47  ;;  %658 = vst.msk [vmem:[#allocation2 + $0x30] sm:$0xff] %vm651_vm4, %v592_v11 }
 0x169   : > { %770 = vrot.lane.b32.xlu1 %v3072_v22, %s2367_s24  ;;  %v2024_v22 = vld [vmem:[%s2471_s10 + $0xe8] sm:$0xff] }
 0x16a   : > { %746 = vrot.lane.b32.xlu0 %v3075_v32, %s2367_s24  ;;  %v2012_v32 = vld [vmem:[%s2471_s10 + $0x88] sm:$0xff]  ;;  %s175_s10 = sand.u32 1, %s2338_s13  }
 0x16b   : > { %v1055_v43 = vpop.permute.xlu1 %1054  ;;  %v1031_v12 = vpop.permute.xlu0 %1030  ;;  %s2187_s21 = smul.u32 192, %s175_s10  ;;  %s3374_s6 = scalar_lea.sflag [#allocation4], %s175_s10 }
 0x16c   : > { %1110 = vst.msk [vmem:[#allocation2 + $0x88] sm:$0xff] %vm1092_vm7, %v1055_v43  ;;  %1098 = vst.msk [vmem:[#allocation2 + $0x28] sm:$0xff] %vm1092_vm7, %v1031_v12 }
 0x16d   : > { %1209 = vrot.lane.b32.xlu1 %v2046_v17, %s2370_s29 }
 0x16e   : > { %1185 = vrot.lane.b32.xlu0 %v2034_v56, %s2370_s29 }
 0x16f   : > { %v1200_v52 = vpop.permute.xlu1 %1199  ;;  %v1176_v59 = vpop.permute.xlu0 %1175 }
 0x170   : > { %1256 = vst.msk [vmem:[#allocation2 + $0x80] sm:$0xff] %vm1239_vm8, %v1200_v52  ;;  %1244 = vst.msk [vmem:[#allocation2 + $0x20] sm:$0xff] %vm1239_vm8, %v1176_v59 }
 0x171   : > { %1354 = vrot.lane.b32.xlu1 %v2069_v33, %s2371_s8 }
 0x172   : > { %1330 = vrot.lane.b32.xlu0 %v2057_v13, %s2371_s8 }
 0x173   : > { %v618_v0 = vpop.permute.xlu1 %617  ;;  %v594_v2 = vpop.permute.xlu0 %593 }
 0x174   : > { %671 = vst.msk [vmem:[#allocation2 + $0x98] sm:$0xff] %vm651_vm4, %v618_v0  ;;  %659 = vst.msk [vmem:[#allocation2 + $0x38] sm:$0xff] %vm651_vm4, %v594_v2 }
 0x175   : > { %772 = vrot.lane.b32.xlu1 %v2045_v62, %s2367_s24 }
 0x176   : > { %748 = vrot.lane.b32.xlu0 %v2033_v8, %s2367_s24 }
 0x177   : > { %v763_v5 = vpop.permute.xlu1 %762  ;;  %v739_v55 = vpop.permute.xlu0 %738 }
 0x178   : > { %817 = vst.msk [vmem:[#allocation2 + $0x90] sm:$0xff] %vm798_vm5, %v763_v5  ;;  %805 = vst.msk [vmem:[#allocation2 + $0x30] sm:$0xff] %vm798_vm5, %v739_v55 }
 0x179   : > { %917 = vrot.lane.b32.xlu1 %v3101_v61, %s2368_s27 }
 0x17a   : > { %893 = vrot.lane.b32.xlu0 %v3104_v9, %s2368_s27 }
 0x17b   : > { %v1202_v16 = vpop.permute.xlu1 %1201  ;;  %v1178_v14 = vpop.permute.xlu0 %1177 }
 0x17c   : > { %1257 = vst.msk [vmem:[#allocation2 + $0x88] sm:$0xff] %vm1239_vm8, %v1202_v16  ;;  %1245 = vst.msk [vmem:[#allocation2 + $0x28] sm:$0xff] %vm1239_vm8, %v1178_v14 }
 0x17d   : > { %1356 = vrot.lane.b32.xlu1 %v2070_v29, %s2371_s8 }
 0x17e   : > { %1332 = vrot.lane.b32.xlu0 %v2058_v40, %s2371_s8 }
 0x17f   : > { %v1347_v15 = vpop.permute.xlu1 %1346  ;;  %v1323_v25 = vpop.permute.xlu0 %1322 }
 0x180   : > { %1403 = vst.msk [vmem:[#allocation2 + $0x80] sm:$0xff] %vm1386_vm9, %v1347_v15  ;;  %1391 = vst.msk [vmem:[#allocation2 + $0x20] sm:$0xff] %vm1386_vm9, %v1323_v25 }
 0x181   : > { %919 = vrot.lane.b32.xlu1 %v2069_v33, %s2368_s27 }
 0x182   : > { %895 = vrot.lane.b32.xlu0 %v2057_v13, %s2368_s27 }
 0x183   : > { %v765_v34 = vpop.permute.xlu1 %764  ;;  %v741_v23 = vpop.permute.xlu0 %740 }
 0x184   : > { %818 = vst.msk [vmem:[#allocation2 + $0x98] sm:$0xff] %vm798_vm5, %v765_v34  ;;  %806 = vst.msk [vmem:[#allocation2 + $0x38] sm:$0xff] %vm798_vm5, %v741_v23 }
 0x185   : > { %1064 = vrot.lane.b32.xlu1 %v2023_v26, %s2369_s28 }
 0x186   : > { %1040 = vrot.lane.b32.xlu0 %v2011_v21, %s2369_s28 }
 0x187   : > { %v910_v24 = vpop.permute.xlu1 %909  ;;  %v886_v28 = vpop.permute.xlu0 %885  ;;  %v1415_v46 = vld [vmem:[#allocation2 + $0x20] sm:$0xff] }
 0x188   : > { %v1427_v37 = vld [vmem:[#allocation2 + $0x80] sm:$0xff]  ;;  %964 = vst.msk [vmem:[#allocation2 + $0x90] sm:$0xff] %vm945_vm6, %v910_v24  ;;  %952 = vst.msk [vmem:[#allocation2 + $0x30] sm:$0xff] %vm945_vm6, %v886_v28  ;;  %2147 = vmatprep.mubr.msk.f32.mxu0 %vm1447_vm10, %v1415_v46 }
 0x189   : > { %2165 = vmatprep.mubr.msk.f32.mxu1 %vm1447_vm10, %v1427_v37  ;;  %1066 = vrot.lane.b32.xlu1 %v2024_v22, %s2369_s28 }
 0x18a   : > { %1042 = vrot.lane.b32.xlu0 %v2012_v32, %s2369_s28  ;;  %s3302_s28 = scalar_lea.vmem [#allocation3], %s2187_s21  ;;  %s2372_s21 = smov [#allocation3]  }
 0x18b   : > { %v1349_v35 = vpop.permute.xlu1 %1348  ;;  %v1325_v39 = vpop.permute.xlu0 %1324  ;;  %s1773_s11 = sshll.u32 %s3302_s28, 4  ;;  %s2274_s24 = sshll.u32 %s2372_s21, 4  ;;  %s3361_s11 = int_to_ptr.vmem [resolvable:$true] %s1773_s11  ;;  %s2275_s24 = int_to_ptr.vmem [resolvable:$false] %s2274_s24 }
 0x18c   : > { %1404 = vst.msk [vmem:[#allocation2 + $0x88] sm:$0xff] %vm1386_vm9, %v1349_v35  ;;  %1392 = vst.msk [vmem:[#allocation2 + $0x28] sm:$0xff] %vm1386_vm9, %v1325_v39  ;;  %s2270_s7 = scalar_lea.vmem %s3361_s11, 3072  ;;  %s2276_s27 = scalar_lea.vmem %s2275_s24, 6144 }
 0x18d   : > { %1211 = vrot.lane.b32.xlu1 %v2047_v6, %s2370_s29  ;;  %p2271_p13 = scmp.ne.s32.totalorder %s3361_s11, %s2270_s7  ;;  %p2277_p2 = scmp.lt.s32.totalorder %s3361_s11, %s2275_s24 }
 0x18e   : > { %1187 = vrot.lane.b32.xlu0 %v2035_v42, %s2370_s29  ;;  %p2278_p4 = scmp.lt.s32.totalorder %s2276_s27, %s2270_s7 }
 0x18f   : > { %v912_v61 = vpop.permute.xlu1 %911  ;;  %v888_v9 = vpop.permute.xlu0 %887  ;;  %p2272_p0 = pnand %p2271_p13, %p2445_p3 }
 0x190   : > { %965 = vst.msk [vmem:[#allocation2 + $0x98] sm:$0xff] %vm945_vm6, %v912_v61  ;;  %953 = vst.msk [vmem:[#allocation2 + $0x38] sm:$0xff] %vm945_vm6, %v888_v9  ;;  %p2279_p5 = por %p2278_p4, %p2277_p2 }
 0x191   : > { %1213 = vrot.lane.b32.xlu1 %v2048_v48, %s2370_s29  ;;  %v3290_v48 = vld [vmem:[%s3428_s2] ss:$0 sm:$0xff]  ;;  %p2273_p1 = pneg %p2272_p0 }
 0x192   : > { %1189 = vrot.lane.b32.xlu0 %v2036_v49, %s2370_s29  ;;  %s1765_s29 = smul.u32 24, %s2346_s15 }
 0x193   : > { %v1057_v3 = vpop.permute.xlu1 %1056  ;;  %v1033_v18 = vpop.permute.xlu0 %1032  ;;  %v1416_v58 = vld [vmem:[#allocation2 + $0x28] sm:$0xff]  ;;  %p2280_p6 = pnand %p2279_p5, %p2273_p1 }
 0x194   : > { %v1428_v4 = vld [vmem:[#allocation2 + $0x88] sm:$0xff]  ;;  %1111 = vst.msk [vmem:[#allocation2 + $0x90] sm:$0xff] %vm1092_vm7, %v1057_v3  ;;  %1099 = vst.msk [vmem:[#allocation2 + $0x30] sm:$0xff] %vm1092_vm7, %v1033_v18  ;;  %2148 = vmatmul.mubr.msk.f32.gmra.mxu0 %vm1447_vm10, %v1416_v58 }
 0x195   : > { %2166 = vmatmul.mubr.msk.f32.gmra.mxu1 %vm1447_vm10, %v1428_v4  ;;  %1358 = vrot.lane.b32.xlu1 %v2071_v45, %s2371_s8 }
 0x196   : > { %1334 = vrot.lane.b32.xlu0 %v2059_v54, %s2371_s8 }
 0x197   : > { %v620_v19 = vpop.permute.xlu1 %619  ;;  %v596_v38 = vpop.permute.xlu0 %595 }
 0x198   : > { %672 = vst.msk [vmem:[#allocation2 + $0xa0] sm:$0xff] %vm651_vm4, %v620_v19  ;;  %660 = vst.msk [vmem:[#allocation2 + $0x40] sm:$0xff] %vm651_vm4, %v596_v38 }
 0x199   : > { %1360 = vrot.lane.b32.xlu1 %v2072_v57, %s2371_s8 }
 0x19a   : > { %1336 = vrot.lane.b32.xlu0 %v2060_v20, %s2371_s8  ;;  %s2189_s8 = smul.u32 48, %s2350_s16 }
 0x19b   : > { %v1059_v27 = vpop.permute.xlu1 %1058 }
 0x19c   : > { %v1035_v36 = vpop.permute.xlu0 %1034  ;;  %1112 = vst.msk [vmem:[#allocation2 + $0x98] sm:$0xff] %vm1092_vm7, %v1059_v27  ;;  %s1770_s9 = sadd.s32 %s2189_s8, %s1765_s29 }
 0x19d   : > { %1100 = vst.msk [vmem:[#allocation2 + $0x38] sm:$0xff] %vm1092_vm7, %v1035_v36  ;;  %s2099_s4 = sshll.u32 %s1770_s9, 7 }
 0x19e   : > { %s3368_s5 = scalar_lea.hbm %s3429_s3, %s2099_s4 }
 0x19f   : > { %v1204_v50 = vpop.permute.xlu1 %1203 }
 0x1a0   : > { %v1180_v51 = vpop.permute.xlu0 %1179  ;;  %1258 = vst.msk [vmem:[#allocation2 + $0x90] sm:$0xff] %vm1239_vm8, %v1204_v50 }
 0x1a1   : > { %1246 = vst.msk [vmem:[#allocation2 + $0x30] sm:$0xff] %vm1239_vm8, %v1180_v51 }
 0x1a3   : > { %v622_v53 = vpop.permute.xlu1 %621 }
 0x1a4   : > { %v598_v60 = vpop.permute.xlu0 %597  ;;  %673 = vst.msk [vmem:[#allocation2 + $0xa8] sm:$0xff] %vm651_vm4, %v622_v53 }
 0x1a5   : > { %661 = vst.msk [vmem:[#allocation2 + $0x48] sm:$0xff] %vm651_vm4, %v598_v60 }
 0x1a7   : > { %v767_v30 = vpop.permute.xlu1 %766 }
 0x1a8   : > { %v743_v41 = vpop.permute.xlu0 %742  ;;  %819 = vst.msk [vmem:[#allocation2 + $0xa0] sm:$0xff] %vm798_vm5, %v767_v30 }
 0x1a9   : > { %807 = vst.msk [vmem:[#allocation2 + $0x40] sm:$0xff] %vm798_vm5, %v743_v41 }
 0x1ab   : > { %v1206_v62 = vpop.permute.xlu1 %1205 }
 0x1ac   : > { %v1182_v8 = vpop.permute.xlu0 %1181  ;;  %1259 = vst.msk [vmem:[#allocation2 + $0x98] sm:$0xff] %vm1239_vm8, %v1206_v62 }
 0x1ad   : > { %1247 = vst.msk [vmem:[#allocation2 + $0x38] sm:$0xff] %vm1239_vm8, %v1182_v8 }
 0x1af   : > { %v1351_v44 = vpop.permute.xlu1 %1350 }
 0x1b0   : > { %v1327_v10 = vpop.permute.xlu0 %1326  ;;  %1405 = vst.msk [vmem:[#allocation2 + $0x90] sm:$0xff] %vm1386_vm9, %v1351_v44 }
 0x1b1   : > { %1393 = vst.msk [vmem:[#allocation2 + $0x30] sm:$0xff] %vm1386_vm9, %v1327_v10 }
 0x1b3   : > { %v769_v31 = vpop.permute.xlu1 %768 }
 0x1b4   : > { %v745_v63 = vpop.permute.xlu0 %744  ;;  %820 = vst.msk [vmem:[#allocation2 + $0xa8] sm:$0xff] %vm798_vm5, %v769_v31 }
 0x1b5   : > { %808 = vst.msk [vmem:[#allocation2 + $0x48] sm:$0xff] %vm798_vm5, %v745_v63 }
 0x1b7   : > { %v914_v1 = vpop.permute.xlu1 %913  ;;  %v1429_v11 = vld [vmem:[#allocation2 + $0x90] sm:$0xff] }
 0x1b8   : > { %v890_v7 = vpop.permute.xlu0 %889  ;;  %v1417_v47 = vld [vmem:[#allocation2 + $0x30] sm:$0xff]  ;;  %966 = vst.msk [vmem:[#allocation2 + $0xa0] sm:$0xff] %vm945_vm6, %v914_v1  ;;  %2168 = vmatprep.mubr.msk.f32.mxu1 %vm1447_vm10, %v1429_v11 }
 0x1b9   : > { %954 = vst.msk [vmem:[#allocation2 + $0x40] sm:$0xff] %vm945_vm6, %v890_v7  ;;  %2150 = vmatprep.mubr.msk.f32.mxu0 %vm1447_vm10, %v1417_v47 }
 0x1bb   : > { %v1353_v17 = vpop.permute.xlu1 %1352 }
 0x1bc   : > { %v1329_v56 = vpop.permute.xlu0 %1328  ;;  %1406 = vst.msk [vmem:[#allocation2 + $0x98] sm:$0xff] %vm1386_vm9, %v1353_v17 }
 0x1bd   : > { %1394 = vst.msk [vmem:[#allocation2 + $0x38] sm:$0xff] %vm1386_vm9, %v1329_v56 }
 0x1bf   : > { %v892_v43 = vpop.permute.xlu1 %891 }
 0x1c0   : > { %v477_v12 = vpop.permute.xlu0 %476  ;;  %955 = vst.msk [vmem:[#allocation2 + $0x48] sm:$0xff] %vm945_vm6, %v892_v43 }
 0x1c1   : > { %527 = vst.msk [vmem:[#allocation2 + $0xb0] sm:$0xff] %vm504_vm3, %v477_v12 }
 0x1c3   : > { %v1037_v33 = vpop.permute.xlu1 %1036  ;;  %v1430_v59 = vld [vmem:[#allocation2 + $0x98] sm:$0xff] }
 0x1c4   : > { %v916_v13 = vpop.permute.xlu0 %915  ;;  %v1418_v52 = vld [vmem:[#allocation2 + $0x38] sm:$0xff]  ;;  %1101 = vst.msk [vmem:[#allocation2 + $0x40] sm:$0xff] %vm1092_vm7, %v1037_v33  ;;  %2169 = vmatmul.mubr.msk.f32.gmra.mxu1 %vm1447_vm10, %v1430_v59 }
 0x1c5   : > { %967 = vst.msk [vmem:[#allocation2 + $0xa8] sm:$0xff] %vm945_vm6, %v916_v13  ;;  %2151 = vmatmul.mubr.msk.f32.gmra.mxu0 %vm1447_vm10, %v1418_v52 }
 0x1c7   : > { %v479_v0 = vpop.permute.xlu1 %478 }
 0x1c8   : > { %v1061_v2 = vpop.permute.xlu0 %1060  ;;  %528 = vst.msk [vmem:[#allocation2 + $0xb8] sm:$0xff] %vm504_vm3, %v479_v0 }
 0x1c9   : > { %1113 = vst.msk [vmem:[#allocation2 + $0xa0] sm:$0xff] %vm1092_vm7, %v1061_v2 }
 0x1cb   : > { %v624_v5 = vpop.permute.xlu1 %623 }
 0x1cc   : > { %v600_v55 = vpop.permute.xlu0 %599  ;;  %674 = vst.msk [vmem:[#allocation2 + $0xb0] sm:$0xff] %vm651_vm4, %v624_v5 }
 0x1cd   : > { %662 = vst.msk [vmem:[#allocation2 + $0x50] sm:$0xff] %vm651_vm4, %v600_v55 }
 0x1cf   : > { %v1063_v29 = vpop.permute.xlu1 %1062 }
 0x1d0   : > { %v1039_v40 = vpop.permute.xlu0 %1038  ;;  %1114 = vst.msk [vmem:[#allocation2 + $0xa8] sm:$0xff] %vm1092_vm7, %v1063_v29 }
 0x1d1   : > { %1102 = vst.msk [vmem:[#allocation2 + $0x48] sm:$0xff] %vm1092_vm7, %v1039_v40 }
 0x1d3   : > { %v1208_v16 = vpop.permute.xlu1 %1207 }
 0x1d4   : > { %v1184_v14 = vpop.permute.xlu0 %1183  ;;  %1260 = vst.msk [vmem:[#allocation2 + $0xa0] sm:$0xff] %vm1239_vm8, %v1208_v16 }
 0x1d5   : > { %1248 = vst.msk [vmem:[#allocation2 + $0x40] sm:$0xff] %vm1239_vm8, %v1184_v14 }
 0x1d7   : > { %v626_v15 = vpop.permute.xlu1 %625 }
 0x1d8   : > { %v602_v25 = vpop.permute.xlu0 %601  ;;  %675 = vst.msk [vmem:[#allocation2 + $0xb8] sm:$0xff] %vm651_vm4, %v626_v15 }
 0x1d9   : > { %663 = vst.msk [vmem:[#allocation2 + $0x58] sm:$0xff] %vm651_vm4, %v602_v25 }
 0x1db   : > { %v771_v26 = vpop.permute.xlu1 %770 }
 0x1dc   : > { %v747_v21 = vpop.permute.xlu0 %746  ;;  %821 = vst.msk [vmem:[#allocation2 + $0xb0] sm:$0xff] %vm798_vm5, %v771_v26 }
 0x1dd   : > { %809 = vst.msk [vmem:[#allocation2 + $0x50] sm:$0xff] %vm798_vm5, %v747_v21 }
 0x1df   : > { %v1210_v34 = vpop.permute.xlu1 %1209 }
 0x1e0   : > { %v1186_v23 = vpop.permute.xlu0 %1185  ;;  %1261 = vst.msk [vmem:[#allocation2 + $0xa8] sm:$0xff] %vm1239_vm8, %v1210_v34 }
 0x1e1   : > { %1249 = vst.msk [vmem:[#allocation2 + $0x48] sm:$0xff] %vm1239_vm8, %v1186_v23 }
 0x1e3   : > { %v1355_v22 = vpop.permute.xlu1 %1354 }
 0x1e4   : > { %v1331_v32 = vpop.permute.xlu0 %1330  ;;  %1407 = vst.msk [vmem:[#allocation2 + $0xa0] sm:$0xff] %vm1386_vm9, %v1355_v22 }
 0x1e5   : > { %1395 = vst.msk [vmem:[#allocation2 + $0x40] sm:$0xff] %vm1386_vm9, %v1331_v32 }
 0x1e7   : > { %v773_v24 = vpop.permute.xlu1 %772 }
 0x1e8   : > { %v749_v28 = vpop.permute.xlu0 %748  ;;  %822 = vst.msk [vmem:[#allocation2 + $0xb8] sm:$0xff] %vm798_vm5, %v773_v24 }
 0x1e9   : > { %810 = vst.msk [vmem:[#allocation2 + $0x58] sm:$0xff] %vm798_vm5, %v749_v28 }
 0x1eb   : > { %v918_v46 = vpop.permute.xlu1 %917  ;;  %v1431_v42 = vld [vmem:[#allocation2 + $0xa0] sm:$0xff] }
 0x1ec   : > { %v894_v37 = vpop.permute.xlu0 %893  ;;  %v1419_v6 = vld [vmem:[#allocation2 + $0x40] sm:$0xff]  ;;  %968 = vst.msk [vmem:[#allocation2 + $0xb0] sm:$0xff] %vm945_vm6, %v918_v46  ;;  %2171 = vmatprep.mubr.msk.f32.mxu1 %vm1447_vm10, %v1431_v42 }
 0x1ed   : > { %956 = vst.msk [vmem:[#allocation2 + $0x50] sm:$0xff] %vm945_vm6, %v894_v37  ;;  %2153 = vmatprep.mubr.msk.f32.mxu0 %vm1447_vm10, %v1419_v6 }
 0x1ef   : > { %v1357_v35 = vpop.permute.xlu1 %1356 }
 0x1f0   : > { %v1333_v39 = vpop.permute.xlu0 %1332  ;;  %1408 = vst.msk [vmem:[#allocation2 + $0xa8] sm:$0xff] %vm1386_vm9, %v1357_v35 }
 0x1f1   : > { %1396 = vst.msk [vmem:[#allocation2 + $0x48] sm:$0xff] %vm1386_vm9, %v1333_v39 }
 0x1f3   : > { %v920_v49 = vpop.permute.xlu1 %919 }
 0x1f4   : > { %v896_v61 = vpop.permute.xlu0 %895  ;;  %969 = vst.msk [vmem:[#allocation2 + $0xb8] sm:$0xff] %vm945_vm6, %v920_v49  ;;  %v2143_v9 = vpop.f32.mrf.mxu0 }
 0x1f5   : > { %957 = vst.msk [vmem:[#allocation2 + $0x58] sm:$0xff] %vm945_vm6, %v896_v61  ;;  %v2161_v45 = vpop.f32.mrf.mxu1  ;;  %v1596_v54 = vadd.f32 %v2143_v9, %v3290_v48 }
 0x1f6   : > { %v1656_v3 = vadd.f32 %v2161_v45, %v3290_v48  ;;  %v1590_v18 = vpop.f32.mrf.mxu0 }
 0x1f7   : > { %v1650_v58 = vpop.f32.mrf.mxu1  ;;  %v1710_v4 = vmax.f32 %v1596_v54, 0.0  ;;  %v1591_v20 = vadd.f32 %v3290_v48, %v1590_v18  ;;  %v1065_v38 = vpop.permute.xlu1 %1064  ;;  %v1432_v50 = vld [vmem:[#allocation2 + $0xa8] sm:$0xff] }
 0x1f8   : > { %v1722_v57 = vmax.f32 %v1656_v3, 0.0  ;;  %v1651_v19 = vadd.f32 %v3290_v48, %v1650_v58  ;;  %v1041_v27 = vpop.permute.xlu0 %1040  ;;  %v1420_v36 = vld [vmem:[#allocation2 + $0x48] sm:$0xff]  ;;  %1115 = vst.msk [vmem:[#allocation2 + $0xb0] sm:$0xff] %vm1092_vm7, %v1065_v38  ;;  %2172 = vmatmul.mubr.msk.f32.gmra.mxu1 %vm1447_vm10, %v1432_v50 }
 0x1f9   : > { %1103 = vst.msk [vmem:[#allocation2 + $0x50] sm:$0xff] %vm1092_vm7, %v1041_v27  ;;  %2154 = vmatmul.mubr.msk.f32.gmra.mxu0 %vm1447_vm10, %v1420_v36  ;;  %1734 = vst [vmem:[%s3302_s28 + $0x8] sm:$0xff] %v1710_v4  ;;  %v1709_v51 = vmax.f32 %v1591_v20, 0.0 }
 0x1fa   : > { %1746 = vst [vmem:[%s3302_s28 + $0x68] sm:$0xff] %v1722_v57  ;;  %v1721_v53 = vmax.f32 %v1651_v19, 0.0 }
 0x1fb   : > { %1733 = vst [vmem:[%s3302_s28] sm:$0xff] %v1709_v51  ;;  %v1067_v60 = vpop.permute.xlu1 %1066 }
 0x1fc   : > { %1745 = vst [vmem:[%s3302_s28 + $0x60] sm:$0xff] %v1721_v53  ;;  %v1043_v30 = vpop.permute.xlu0 %1042  ;;  %1116 = vst.msk [vmem:[#allocation2 + $0xb8] sm:$0xff] %vm1092_vm7, %v1067_v60 }
 0x1fd   : > { %1104 = vst.msk [vmem:[#allocation2 + $0x58] sm:$0xff] %vm1092_vm7, %v1043_v30 }
 0x1ff   : > { %v1212_v41 = vpop.permute.xlu1 %1211 }
 0x200   : > { %v1188_v62 = vpop.permute.xlu0 %1187  ;;  %1262 = vst.msk [vmem:[#allocation2 + $0xb0] sm:$0xff] %vm1239_vm8, %v1212_v41 }
 0x201   : > { %1250 = vst.msk [vmem:[#allocation2 + $0x50] sm:$0xff] %vm1239_vm8, %v1188_v62 }
 0x203   : > { %v1214_v8 = vpop.permute.xlu1 %1213 }
 0x204   : > { %v1190_v44 = vpop.permute.xlu0 %1189  ;;  %1263 = vst.msk [vmem:[#allocation2 + $0xb8] sm:$0xff] %vm1239_vm8, %v1214_v8 }
 0x205   : > { %1251 = vst.msk [vmem:[#allocation2 + $0x58] sm:$0xff] %vm1239_vm8, %v1190_v44 }
 0x207   : > { %v1359_v10 = vpop.permute.xlu1 %1358 }
 0x208   : > { %v1335_v31 = vpop.permute.xlu0 %1334  ;;  %1409 = vst.msk [vmem:[#allocation2 + $0xb0] sm:$0xff] %vm1386_vm9, %v1359_v10 }
 0x209   : > { %1397 = vst.msk [vmem:[#allocation2 + $0x50] sm:$0xff] %vm1386_vm9, %v1335_v31 }
 0x20b   : > { %v1361_v63 = vpop.permute.xlu1 %1360 }
 0x20c   : > { %v1337_v1 = vpop.permute.xlu0 %1336  ;;  %1410 = vst.msk [vmem:[#allocation2 + $0xb8] sm:$0xff] %vm1386_vm9, %v1361_v63 }
 0x20d   : > { %1398 = vst.msk [vmem:[#allocation2 + $0x58] sm:$0xff] %vm1386_vm9, %v1337_v1 }
 0x20f   : > { %v1433_v47 = vld [vmem:[#allocation2 + $0xb0] sm:$0xff] }
 0x210   : > { %v1421_v7 = vld [vmem:[#allocation2 + $0x50] sm:$0xff]  ;;  %2174 = vmatprep.mubr.msk.f32.mxu1 %vm1447_vm10, %v1433_v47 }
 0x211   : > { %2156 = vmatprep.mubr.msk.f32.mxu0 %vm1447_vm10, %v1421_v7 }
 0x213   : > { %v1434_v17 = vld [vmem:[#allocation2 + $0xb8] sm:$0xff] }
 0x214   : > { %v1422_v11 = vld [vmem:[#allocation2 + $0x58] sm:$0xff]  ;;  %2175 = vmatmul.mubr.msk.f32.gmra.mxu1 %vm1447_vm10, %v1434_v17 }
 0x215   : > { %2157 = vmatmul.mubr.msk.f32.gmra.mxu0 %vm1447_vm10, %v1422_v11 }
 0x224   : > { %v2146_v56 = vpop.f32.mrf.mxu0 }
 0x225   : > { %v2164_v43 = vpop.f32.mrf.mxu1  ;;  %v1606_v12 = vadd.f32 %v2146_v56, %v3290_v48 }
 0x226   : > { %v1666_v33 = vadd.f32 %v2164_v43, %v3290_v48  ;;  %v1600_v13 = vpop.f32.mrf.mxu0 }
 0x227   : > { %v1660_v52 = vpop.f32.mrf.mxu1  ;;  %v1712_v59 = vmax.f32 %v1606_v12, 0.0  ;;  %v1601_v2 = vadd.f32 %v3290_v48, %v1600_v13 }
 0x228   : > { %v1724_v0 = vmax.f32 %v1666_v33, 0.0  ;;  %v1661_v5 = vadd.f32 %v3290_v48, %v1660_v52 }
 0x229   : > { %1736 = vst [vmem:[%s3302_s28 + $0x18] sm:$0xff] %v1712_v59  ;;  %v1711_v55 = vmax.f32 %v1601_v2, 0.0 }
 0x22a   : > { %1748 = vst [vmem:[%s3302_s28 + $0x78] sm:$0xff] %v1724_v0  ;;  %v1723_v29 = vmax.f32 %v1661_v5, 0.0 }
 0x22b   : > { %1735 = vst [vmem:[%s3302_s28 + $0x10] sm:$0xff] %v1711_v55 }
 0x22c   : > { %1747 = vst [vmem:[%s3302_s28 + $0x70] sm:$0xff] %v1723_v29 }
 0x254   : > { %v2149_v40 = vpop.f32.mrf.mxu0 }
 0x255   : > { %v2167_v16 = vpop.f32.mrf.mxu1  ;;  %v1616_v14 = vadd.f32 %v2149_v40, %v3290_v48 }
 0x256   : > { %v1676_v15 = vadd.f32 %v2167_v16, %v3290_v48  ;;  %v1610_v25 = vpop.f32.mrf.mxu0 }
 0x257   : > { %v1670_v26 = vpop.f32.mrf.mxu1  ;;  %v1714_v21 = vmax.f32 %v1616_v14, 0.0  ;;  %v1611_v23 = vadd.f32 %v3290_v48, %v1610_v25 }
 0x258   : > { %v1726_v34 = vmax.f32 %v1676_v15, 0.0  ;;  %v1671_v22 = vadd.f32 %v3290_v48, %v1670_v26 }
 0x259   : > { %1738 = vst [vmem:[%s3302_s28 + $0x28] sm:$0xff] %v1714_v21  ;;  %v1713_v32 = vmax.f32 %v1611_v23, 0.0 }
 0x25a   : > { %1750 = vst [vmem:[%s3302_s28 + $0x88] sm:$0xff] %v1726_v34  ;;  %v1725_v24 = vmax.f32 %v1671_v22, 0.0 }
 0x25b   : > { %1737 = vst [vmem:[%s3302_s28 + $0x20] sm:$0xff] %v1713_v32 }
 0x25c   : > { %1749 = vst [vmem:[%s3302_s28 + $0x80] sm:$0xff] %v1725_v24 }
 0x284   : > { %v2170_v46 = vpop.f32.mrf.mxu1 }
 0x285   : > { %v2152_v28 = vpop.f32.mrf.mxu0  ;;  %v1686_v6 = vadd.f32 %v2170_v46, %v3290_v48 }
 0x286   : > { %v1626_v37 = vadd.f32 %v2152_v28, %v3290_v48  ;;  %v1680_v35 = vpop.f32.mrf.mxu1 }
 0x287   : > { %v1620_v42 = vpop.f32.mrf.mxu0  ;;  %v1728_v49 = vmax.f32 %v1686_v6, 0.0  ;;  %v1681_v9 = vadd.f32 %v3290_v48, %v1680_v35 }
 0x288   : > { %v1716_v39 = vmax.f32 %v1626_v37, 0.0  ;;  %v1621_v61 = vadd.f32 %v3290_v48, %v1620_v42 }
 0x289   : > { %1752 = vst [vmem:[%s3302_s28 + $0x98] sm:$0xff] %v1728_v49  ;;  %v1727_v54 = vmax.f32 %v1681_v9, 0.0 }
 0x28a   : > { %1740 = vst [vmem:[%s3302_s28 + $0x38] sm:$0xff] %v1716_v39  ;;  %v1715_v45 = vmax.f32 %v1621_v61, 0.0 }
 0x28b   : > { %1751 = vst [vmem:[%s3302_s28 + $0x90] sm:$0xff] %v1727_v54 }
 0x28c   : > { %1739 = vst [vmem:[%s3302_s28 + $0x30] sm:$0xff] %v1715_v45 }
 0x2b8   : > { %v2173_v18 = vpop.f32.mrf.mxu1 }
 0x2b9   : > { %v2155_v3 = vpop.f32.mrf.mxu0  ;;  %v1696_v4 = vadd.f32 %v2173_v18, %v3290_v48 }
 0x2ba   : > { %v1636_v58 = vadd.f32 %v2155_v3, %v3290_v48  ;;  %v1690_v20 = vpop.f32.mrf.mxu1 }
 0x2bb   : > { %v1630_v57 = vpop.f32.mrf.mxu0  ;;  %v1730_v38 = vmax.f32 %v1696_v4, 0.0  ;;  %v1691_v36 = vadd.f32 %v3290_v48, %v1690_v20 }
 0x2bc   : > { %v1718_v19 = vmax.f32 %v1636_v58, 0.0  ;;  %v1631_v27 = vadd.f32 %v3290_v48, %v1630_v57 }
 0x2bd   : > { %1754 = vst [vmem:[%s3302_s28 + $0xa8] sm:$0xff] %v1730_v38  ;;  %v1729_v51 = vmax.f32 %v1691_v36, 0.0 }
 0x2be   : > { %1742 = vst [vmem:[%s3302_s28 + $0x48] sm:$0xff] %v1718_v19  ;;  %v1717_v50 = vmax.f32 %v1631_v27, 0.0 }
 0x2bf   : > { %1753 = vst [vmem:[%s3302_s28 + $0xa0] sm:$0xff] %v1729_v51 }
 0x2c0   : > { %1741 = vst [vmem:[%s3302_s28 + $0x40] sm:$0xff] %v1717_v50 }
 0x2d4   : > { %v2176_v60 = vpop.f32.mrf.mxu1 }
 0x2d5   : > { %v2158_v53 = vpop.f32.mrf.mxu0  ;;  %v1706_v41 = vadd.f32 %v2176_v60, %v3290_v48 }
 0x2d6   : > { %v1646_v30 = vadd.f32 %v2158_v53, %v3290_v48  ;;  %v1700_v8 = vpop.f32.mrf.mxu1 }
 0x2d7   : > { %v1640_v62 = vpop.f32.mrf.mxu0  ;;  %v1732_v10 = vmax.f32 %v1706_v41, 0.0  ;;  %v1701_v63 = vadd.f32 %v3290_v48, %v1700_v8 }
 0x2d8   : > { %v1720_v44 = vmax.f32 %v1646_v30, 0.0  ;;  %v1641_v31 = vadd.f32 %v3290_v48, %v1640_v62 }
 0x2d9   : > { %1756 = vst [vmem:[%s3302_s28 + $0xb8] sm:$0xff] %v1732_v10  ;;  %v1731_v7 = vmax.f32 %v1701_v63, 0.0 }
 0x2da   : > { %1744 = vst [vmem:[%s3302_s28 + $0x58] sm:$0xff] %v1720_v44  ;;  %v1719_v1 = vmax.f32 %v1641_v31, 0.0 }
 0x2db   : > { %1755 = vst [vmem:[%s3302_s28 + $0xb0] sm:$0xff] %v1731_v7 }
 0x2dc   : > { %1743 = vst [vmem:[%s3302_s28 + $0x50] sm:$0xff] %v1719_v1 }
 0x2dd   : > { %2283 = shalt.err (!%p2280_p6)
}
 0x2de   : > { %s2284_s10 = scalar_lea.hbm %s3368_s5, 3072  ;;  %s2288_s8 = scalar_lea.hbm %s3429_s3, 12288 }
 0x2df   : > { %p2285_p7 = scmp.ne.s32.totalorder %s3368_s5, %s2284_s10  ;;  %p2289_p11 = scmp.lt.s32.totalorder %s3368_s5, %s3429_s3 }
 0x2e0   : > { %p2290_p12 = scmp.lt.s32.totalorder %s2288_s8, %s2284_s10 }
 0x2e1   : > { %p2286_p9 = pnand %p2285_p7, %p2445_p3 }
 0x2e2   : > { %p2291_p13 = por %p2290_p12, %p2289_p11 }
 0x2e3   : > { %p2287_p10 = pneg %p2286_p9 }
 0x2e5   : > { %p2292_p0 = pnand %p2291_p13, %p2287_p10 }
 0x2e7   : > { %2295 = shalt.err (!%p2292_p0)
}
 0x2e8   : > { %s2373_s15 = smov 128  }
 0x2e9   : > { %2190 = dma.vmem_to_hbm [thread:$0]  (%p2445_p3), %s3361_s11, 3072, %s3368_s5, %s3374_s6, %s2373_s15, %s2373_s15, %s2365_s20  }
 0x2ea PF: > { %p2196_p1 = scmp.ge.s32.totalorder %s2362_s19, 2  ;;  %s1788_s16 = sand.u32 1, %s2334_s12  }
 0x2eb   : > { %s1789_s7 = scalar_lea.sflag [#allocation4], %s1788_s16 }
 0x2ec   : > { %p2193_p2 = pnand %p2196_p1, %p2454_p8 }
 0x2ee   : > { %p2194_p4 = pneg %p2193_p2 }
 0x2f0   : > { %2329 = dma.done.wait (%p2194_p4), %s1789_s7, 3072  }
 0x2f1   : > { %2331 = vsyncadd (%p2194_p4), %s1789_s7, 4294964224  ;;  %s16_s19 = sadd.s32 1, %s2362_s19   ;;  %s3432_s12 = smov %s2338_s13 }
 0x2f2   : > { %p13_p5 = scmp.ge.s32.totalorder %s16_s19, 6   ;;  %s3433_s13 = smov %s2342_s14 }
 0x2f3   : > { %s3434_s14 = smov %s2463_s30  ;;  %s3435_s15 = smov %s2354_s17 }
 0x2f4   : > { %s3436_s16 = smov %s2358_s18  ;;  %s3437_s17 = smov %s3440_s22 }
 0x2f5   : > { %s3438_s18 = smov %s3444_s23  ;;  %15 = sbr.rel (!%p13_p5) target bundleno = 5 (0x5), region = 76 }
 0x2fa   :  { %1794 = vsyncpa [#allocation4], 1 }
 0x2fb   :  { %1796 = vsyncpa [#allocation4 + $0x1], 1 }

</bundles_post_ra>
